<compile_context>
chip_gen: v6e
topology: v6e:2x2x1
jax: 0.10.0
libtpu: 0.0.40
codegen_flags: <defaults>
</compile_context>

<pallas_src>
import functools
import math

import jax
import jax.numpy as jnp
from jax.experimental import pallas as pl
from jax.experimental.pallas import tpu as pltpu


def _attention_kernel(x_ref, wkq_ref, vbd_ref, o_ref, *, num_heads, exact_softmax):
    """One N-row tile: per-head fused-K scores, softmax, block-diag AV, residual."""
    cdt = wkq_ref.dtype                     # matmul-operand dtype (pre-cast by wrapper)
    x = x_ref[...]                          # (TILE_N, D) residual source
    xc = x.astype(cdt)
    acc = x.astype(jnp.float32)             # start the accumulator with the residual

    # Static unroll over heads (H is small); each head is two well-shaped MXU ops.
    for h in range(num_heads):
        # Scores: (TILE_N, in_dim) @ (in_dim, M)  -- full-depth contraction,
        # 1/sqrt(d_k) already folded into wkq by the wrapper.
        s = jnp.dot(xc, wkq_ref[h], preferred_element_type=jnp.float32)   # (T, M) f32

        # Softmax over the query axis (lane reduce).
        s = s - jnp.max(s, axis=-1, keepdims=True)
        p = jnp.exp(s)
        denom = jnp.sum(p, axis=-1, keepdims=True)
        if exact_softmax:
            p = p / denom
        else:
            p = p * pl.reciprocal(denom, approx=True)
        # TODO(synk): nn.Dropout(0.1) on the attention weights is identity in
        # eval/inference mode; omitted here (kernel is not a drop-in for training).

        # Block-diagonal V places head h's output in its own column block, so the
        # sum over heads lands in merged-head layout with a full-width output.
        acc = acc + jnp.dot(p.astype(cdt), vbd_ref[h],
                            preferred_element_type=jnp.float32)           # (T, D) f32

    o_ref[...] = acc.astype(o_ref.dtype)    # single lane-dense full-width store


def _round_up(v, m):
    return ((v + m - 1) // m) * m


def cross_graph_former(x, q_x, wq, wk, wv, *, num_heads,
                       matmul_dtype=jnp.bfloat16, tile_n=512, donate_x=False):
    """out = softmax((x@Wk)(q_x@Wq)^T / sqrt(d_k)) @ (q_x@Wv) + x   (per head)."""
    num_data, in_dim = x.shape
    num_query, in_dim_q = q_x.shape
    out_dim = wq.shape[1]
    assert in_dim_q == in_dim
    assert wq.shape == wk.shape == wv.shape == (in_dim, out_dim)
    assert out_dim % num_heads == 0
    assert in_dim == out_dim, "residual add requires in_dim == out_dim"
    d_k = out_dim // num_heads

    cdt = jnp.dtype(matmul_dtype) if matmul_dtype is not None else jnp.dtype(x.dtype)
    exact_softmax = matmul_dtype is None

    # ---- tiny precomputes done in plain XLA (no extra pallas_call) -----------
    f32 = jnp.float32
    q2d = jnp.dot(q_x.astype(f32), wq.astype(f32)) * (1.0 / math.sqrt(d_k))  # (M, D)
    v2d = jnp.dot(q_x.astype(f32), wv.astype(f32))                           # (M, D)

    # wkq[h] = Wk[:, h-block] @ Q[:, h-block].T   -> (H, in_dim, M), scale folded in.
    wkq = jnp.einsum('dhk,mhk->hdm',
                     wk.astype(f32).reshape(in_dim, num_heads, d_k),
                     q2d.reshape(num_query, num_heads, d_k))

    # Block-diagonal V: vbd[h, m, d] = V[m, d] if d in head-h column block else 0.
    head_mask = (jnp.arange(out_dim) // d_k)[None, :] == jnp.arange(num_heads)[:, None]
    vbd = v2d[None, :, :] * head_mask[:, None, :].astype(f32)                # (H, M, D)

    # Pre-cast resident operands once (not per grid step inside the kernel).
    wkq = wkq.astype(cdt)
    vbd = vbd.astype(cdt)

    # ---- generation-aware tile-size / VMEM budgeting --------------------------
    try:
        vmem_cap = int(pltpu.get_tpu_info().vmem_capacity_bytes)
    except Exception:
        vmem_cap = 64 * 1024 * 1024          # conservative fallback (v7x per-TC)
    budget = int(vmem_cap * 0.6)

    in_b = jnp.dtype(x.dtype).itemsize
    c_b = cdt.itemsize
    m_lanes = _round_up(num_query, 128)      # lane padding of per-head score tiles

    def vmem_estimate(t):
        est = 2 * t * in_dim * in_b                      # x tile (double-buffered)
        est += 2 * t * out_dim * in_b                    # out tile (double-buffered)
        est += 2 * num_heads * in_dim * num_query * c_b  # resident wkq
        est += 2 * num_heads * num_query * out_dim * c_b # resident block-diag V
        est += 3 * t * m_lanes * 4                       # live score / prob temporaries
        est += 2 * t * out_dim * 4                       # f32 accumulator + staging
        return est

    # TILE_N in multiples of 128 (min 64): clean MXU row passes / sublane packing.
    tile_n = max(128, min(_round_up(tile_n, 128), _round_up(num_data, 128)))
    while tile_n > 128 and vmem_estimate(tile_n) > budget:
        tile_n = max(128, _round_up(tile_n // 2, 128))
    if tile_n == 128 and vmem_estimate(tile_n) > budget:
        tile_n = 64                                       # last-resort shrink
    # TODO(synk): for very large num_query an online-softmax over M-chunks
    # (flash-style) would bound the per-head (TILE_N, M) score intermediates.

    n_pad = _round_up(num_data, tile_n)
    padded = n_pad != num_data
    x_in = jnp.pad(x, ((0, n_pad - num_data), (0, 0))) if padded else x
    num_tiles = n_pad // tile_n

    vmem_limit = int(min(int(vmem_cap * 0.85),
                         max(vmem_estimate(tile_n) * 2, 32 * 1024 * 1024)))
    vmem_limit = max(vmem_limit, vmem_estimate(tile_n) + (4 * 1024 * 1024))

    kernel = functools.partial(_attention_kernel, num_heads=num_heads,
                               exact_softmax=exact_softmax)

    out = pl.pallas_call(
        kernel,
        out_shape=jax.ShapeDtypeStruct((n_pad, out_dim), x.dtype),
        grid=(num_tiles,),
        in_specs=[
            pl.BlockSpec((tile_n, in_dim), lambda i: (i, 0)),                 # x rows (tiled)
            pl.BlockSpec((num_heads, in_dim, num_query), lambda i: (0, 0, 0)),# wkq (resident)
            pl.BlockSpec((num_heads, num_query, out_dim), lambda i: (0, 0, 0)),# vbd (resident)
        ],
        out_specs=pl.BlockSpec((tile_n, out_dim), lambda i: (i, 0)),
        # Reuse the (private) padded x buffer as the output when available.
        input_output_aliases=({0: 0} if (padded or donate_x) else {}),
        compiler_params=pltpu.CompilerParams(
            dimension_semantics=("parallel",),
            vmem_limit_bytes=vmem_limit),
    )(x_in, wkq, vbd)

    return out[:num_data] if padded else out


def _kaiming_uniform(key, in_dim, out_dim):
    # torch.nn.init.kaiming_uniform_(W, a=sqrt(5)) on an (in_dim, out_dim) tensor:
    # fan_in = W.size(1) = out_dim, gain = sqrt(2/(1+5)) -> bound = 1/sqrt(fan_in)
    bound = 1.0 / math.sqrt(out_dim)
    return jax.random.uniform(key, (in_dim, out_dim), jnp.float32,
                              minval=-bound, maxval=bound)


def _reference(x, q_x, wq, wk, wv, num_heads):
    m, n = q_x.shape[0], x.shape[0]
    d = wq.shape[1]
    d_k = d // num_heads
    q = (q_x @ wq).reshape(m, num_heads, d_k).transpose(1, 0, 2)
    k = (x @ wk).reshape(n, num_heads, d_k).transpose(1, 0, 2)
    v = (q_x @ wv).reshape(m, num_heads, d_k).transpose(1, 0, 2)
    s = jnp.einsum('hnd,hmd->hnm', k, q) / math.sqrt(d_k)
    p = jax.nn.softmax(s, axis=-1)
    o = jnp.einsum('hnm,hmd->hnd', p, v)
    return o.transpose(1, 0, 2).reshape(n, d) + x


if __name__ == "__main__":
    # Small shapes consistent with the module (graph node-set cross attention).
    num_data, num_query = 200, 48       # num_data not a tile multiple -> exercises padding
    in_dim = out_dim = 64
    num_heads = 4

    key = jax.random.PRNGKey(0)
    kx, kq, k1, k2, k3 = jax.random.split(key, 5)
    x = jax.random.normal(kx, (num_data, in_dim), jnp.float32)
    q_x = jax.random.normal(kq, (num_query, in_dim), jnp.float32)
    wq = _kaiming_uniform(k1, in_dim, out_dim)
    wk = _kaiming_uniform(k2, in_dim, out_dim)
    wv = _kaiming_uniform(k3, in_dim, out_dim)

    ref = _reference(x, q_x, wq, wk, wv, num_heads)

    # Exact-semantics f32 matmul path (tile_n=128 -> 2 grid steps, exercises padding).
    out_f32 = jax.block_until_ready(
        cross_graph_former(x, q_x, wq, wk, wv, num_heads=num_heads,
                           matmul_dtype=None, tile_n=128))
    assert out_f32.shape == (num_data, out_dim)
    err32 = float(jnp.max(jnp.abs(out_f32 - ref)))
    assert jnp.allclose(out_f32, ref, atol=2e-3, rtol=2e-3), f"f32 max err {err32}"

    # Default bf16 matmul-operand path (recommended on v5e / v6e / v7x).
    out_bf16 = jax.block_until_ready(
        cross_graph_former(x, q_x, wq, wk, wv, num_heads=num_heads))
    assert out_bf16.shape == (num_data, out_dim)
    err16 = float(jnp.max(jnp.abs(out_bf16 - ref)))
    assert jnp.allclose(out_bf16, ref, atol=5e-2, rtol=5e-2), f"bf16 max err {err16}"

    print("KERNEL_OK")
</pallas_src>

<mosaic_0001>
module attributes {stable_mosaic.version = 11 : i64} {
  func.func @_attention_kernel(%arg0: i32, %arg1: memref<128x64xf32, #tpu.memory_space<vmem>>, %arg2: memref<4x64x48xf32, #tpu.memory_space<vmem>>, %arg3: memref<4x48x64xf32, #tpu.memory_space<vmem>>, %arg4: memref<128x64xf32, #tpu.memory_space<vmem>>) attributes {dimension_semantics = [#tpu.dimension_semantics<parallel>], iteration_bounds = array<i64: 2>, scalar_prefetch = 0 : i64, scratch_operands = 0 : i64, tpu.core_type = #tpu.core_type<tc>, window_params = [{transform_indices = @transform_0, window_bounds = array<i64: 128, 64>}, {pipeline_mode = #tpu.pipeline_mode<synchronous>, transform_indices = @transform_1, window_bounds = array<i64: 4, 64, 48>}, {pipeline_mode = #tpu.pipeline_mode<synchronous>, transform_indices = @transform_2, window_bounds = array<i64: 4, 48, 64>}, {transform_indices = @transform_3, window_bounds = array<i64: 128, 64>}]} {
    %c0 = arith.constant 0 : index
    %c0_0 = arith.constant 0 : index
    %0 = vector.load %arg1[%c0, %c0_0] : memref<128x64xf32, #tpu.memory_space<vmem>>, vector<128x64xf32>
    %c0_1 = arith.constant 0 : index
    %c0_2 = arith.constant 0 : index
    %c0_3 = arith.constant 0 : index
    %1 = vector.load %arg2[%c0_1, %c0_2, %c0_3] : memref<4x64x48xf32, #tpu.memory_space<vmem>>, vector<1x64x48xf32>
    %2 = vector.shape_cast %1 : vector<1x64x48xf32> to vector<64x48xf32>
    %cst = arith.constant dense<0.000000e+00> : vector<128x48xf32>
    %3 = tpu.matmul %0, %2, %cst {dimension_numbers = #tpu.dot_dimension_numbers<[1], [0], [0], [1], [0, 0, 1, 1], [], []>} : vector<128x64xf32>, vector<64x48xf32>, vector<128x48xf32> -> vector<128x48xf32>
    %cst_4 = arith.constant dense<0xFF800000> : vector<128xf32>
    %4 = vector.multi_reduction <maximumf>, %3, %cst_4 [1] : vector<128x48xf32> to vector<128xf32>
    %5 = vector.shape_cast %4 : vector<128xf32> to vector<128x1xf32>
    %6 = vector.broadcast %5 : vector<128x1xf32> to vector<128x48xf32>
    %7 = arith.subf %3, %6 : vector<128x48xf32>
    %8 = math.exp %7 : vector<128x48xf32>
    %cst_5 = arith.constant dense<0.000000e+00> : vector<128xf32>
    %9 = vector.multi_reduction <add>, %8, %cst_5 [1] : vector<128x48xf32> to vector<128xf32>
    %10 = vector.shape_cast %9 : vector<128xf32> to vector<128x1xf32>
    %11 = vector.broadcast %10 : vector<128x1xf32> to vector<128x48xf32>
    %12 = arith.divf %8, %11 : vector<128x48xf32>
    %c0_6 = arith.constant 0 : index
    %c0_7 = arith.constant 0 : index
    %c0_8 = arith.constant 0 : index
    %13 = vector.load %arg3[%c0_6, %c0_7, %c0_8] : memref<4x48x64xf32, #tpu.memory_space<vmem>>, vector<1x48x64xf32>
    %14 = vector.shape_cast %13 : vector<1x48x64xf32> to vector<48x64xf32>
    %cst_9 = arith.constant dense<0.000000e+00> : vector<128x64xf32>
    %15 = tpu.matmul %12, %14, %cst_9 {dimension_numbers = #tpu.dot_dimension_numbers<[1], [0], [0], [1], [0, 0, 1, 1], [], []>} : vector<128x48xf32>, vector<48x64xf32>, vector<128x64xf32> -> vector<128x64xf32>
    %16 = arith.addf %0, %15 : vector<128x64xf32>
    %c1 = arith.constant 1 : index
    %c0_10 = arith.constant 0 : index
    %c0_11 = arith.constant 0 : index
    %17 = vector.load %arg2[%c1, %c0_10, %c0_11] : memref<4x64x48xf32, #tpu.memory_space<vmem>>, vector<1x64x48xf32>
    %18 = vector.shape_cast %17 : vector<1x64x48xf32> to vector<64x48xf32>
    %cst_12 = arith.constant dense<0.000000e+00> : vector<128x48xf32>
    %19 = tpu.matmul %0, %18, %cst_12 {dimension_numbers = #tpu.dot_dimension_numbers<[1], [0], [0], [1], [0, 0, 1, 1], [], []>} : vector<128x64xf32>, vector<64x48xf32>, vector<128x48xf32> -> vector<128x48xf32>
    %cst_13 = arith.constant dense<0xFF800000> : vector<128xf32>
    %20 = vector.multi_reduction <maximumf>, %19, %cst_13 [1] : vector<128x48xf32> to vector<128xf32>
    %21 = vector.shape_cast %20 : vector<128xf32> to vector<128x1xf32>
    %22 = vector.broadcast %21 : vector<128x1xf32> to vector<128x48xf32>
    %23 = arith.subf %19, %22 : vector<128x48xf32>
    %24 = math.exp %23 : vector<128x48xf32>
    %cst_14 = arith.constant dense<0.000000e+00> : vector<128xf32>
    %25 = vector.multi_reduction <add>, %24, %cst_14 [1] : vector<128x48xf32> to vector<128xf32>
    %26 = vector.shape_cast %25 : vector<128xf32> to vector<128x1xf32>
    %27 = vector.broadcast %26 : vector<128x1xf32> to vector<128x48xf32>
    %28 = arith.divf %24, %27 : vector<128x48xf32>
    %c1_15 = arith.constant 1 : index
    %c0_16 = arith.constant 0 : index
    %c0_17 = arith.constant 0 : index
    %29 = vector.load %arg3[%c1_15, %c0_16, %c0_17] : memref<4x48x64xf32, #tpu.memory_space<vmem>>, vector<1x48x64xf32>
    %30 = vector.shape_cast %29 : vector<1x48x64xf32> to vector<48x64xf32>
    %cst_18 = arith.constant dense<0.000000e+00> : vector<128x64xf32>
    %31 = tpu.matmul %28, %30, %cst_18 {dimension_numbers = #tpu.dot_dimension_numbers<[1], [0], [0], [1], [0, 0, 1, 1], [], []>} : vector<128x48xf32>, vector<48x64xf32>, vector<128x64xf32> -> vector<128x64xf32>
    %32 = arith.addf %16, %31 : vector<128x64xf32>
    %c2 = arith.constant 2 : index
    %c0_19 = arith.constant 0 : index
    %c0_20 = arith.constant 0 : index
    %33 = vector.load %arg2[%c2, %c0_19, %c0_20] : memref<4x64x48xf32, #tpu.memory_space<vmem>>, vector<1x64x48xf32>
    %34 = vector.shape_cast %33 : vector<1x64x48xf32> to vector<64x48xf32>
    %cst_21 = arith.constant dense<0.000000e+00> : vector<128x48xf32>
    %35 = tpu.matmul %0, %34, %cst_21 {dimension_numbers = #tpu.dot_dimension_numbers<[1], [0], [0], [1], [0, 0, 1, 1], [], []>} : vector<128x64xf32>, vector<64x48xf32>, vector<128x48xf32> -> vector<128x48xf32>
    %cst_22 = arith.constant dense<0xFF800000> : vector<128xf32>
    %36 = vector.multi_reduction <maximumf>, %35, %cst_22 [1] : vector<128x48xf32> to vector<128xf32>
    %37 = vector.shape_cast %36 : vector<128xf32> to vector<128x1xf32>
    %38 = vector.broadcast %37 : vector<128x1xf32> to vector<128x48xf32>
    %39 = arith.subf %35, %38 : vector<128x48xf32>
    %40 = math.exp %39 : vector<128x48xf32>
    %cst_23 = arith.constant dense<0.000000e+00> : vector<128xf32>
    %41 = vector.multi_reduction <add>, %40, %cst_23 [1] : vector<128x48xf32> to vector<128xf32>
    %42 = vector.shape_cast %41 : vector<128xf32> to vector<128x1xf32>
    %43 = vector.broadcast %42 : vector<128x1xf32> to vector<128x48xf32>
    %44 = arith.divf %40, %43 : vector<128x48xf32>
    %c2_24 = arith.constant 2 : index
    %c0_25 = arith.constant 0 : index
    %c0_26 = arith.constant 0 : index
    %45 = vector.load %arg3[%c2_24, %c0_25, %c0_26] : memref<4x48x64xf32, #tpu.memory_space<vmem>>, vector<1x48x64xf32>
    %46 = vector.shape_cast %45 : vector<1x48x64xf32> to vector<48x64xf32>
    %cst_27 = arith.constant dense<0.000000e+00> : vector<128x64xf32>
    %47 = tpu.matmul %44, %46, %cst_27 {dimension_numbers = #tpu.dot_dimension_numbers<[1], [0], [0], [1], [0, 0, 1, 1], [], []>} : vector<128x48xf32>, vector<48x64xf32>, vector<128x64xf32> -> vector<128x64xf32>
    %48 = arith.addf %32, %47 : vector<128x64xf32>
    %c3 = arith.constant 3 : index
    %c0_28 = arith.constant 0 : index
    %c0_29 = arith.constant 0 : index
    %49 = vector.load %arg2[%c3, %c0_28, %c0_29] : memref<4x64x48xf32, #tpu.memory_space<vmem>>, vector<1x64x48xf32>
    %50 = vector.shape_cast %49 : vector<1x64x48xf32> to vector<64x48xf32>
    %cst_30 = arith.constant dense<0.000000e+00> : vector<128x48xf32>
    %51 = tpu.matmul %0, %50, %cst_30 {dimension_numbers = #tpu.dot_dimension_numbers<[1], [0], [0], [1], [0, 0, 1, 1], [], []>} : vector<128x64xf32>, vector<64x48xf32>, vector<128x48xf32> -> vector<128x48xf32>
    %cst_31 = arith.constant dense<0xFF800000> : vector<128xf32>
    %52 = vector.multi_reduction <maximumf>, %51, %cst_31 [1] : vector<128x48xf32> to vector<128xf32>
    %53 = vector.shape_cast %52 : vector<128xf32> to vector<128x1xf32>
    %54 = vector.broadcast %53 : vector<128x1xf32> to vector<128x48xf32>
    %55 = arith.subf %51, %54 : vector<128x48xf32>
    %56 = math.exp %55 : vector<128x48xf32>
    %cst_32 = arith.constant dense<0.000000e+00> : vector<128xf32>
    %57 = vector.multi_reduction <add>, %56, %cst_32 [1] : vector<128x48xf32> to vector<128xf32>
    %58 = vector.shape_cast %57 : vector<128xf32> to vector<128x1xf32>
    %59 = vector.broadcast %58 : vector<128x1xf32> to vector<128x48xf32>
    %60 = arith.divf %56, %59 : vector<128x48xf32>
    %c3_33 = arith.constant 3 : index
    %c0_34 = arith.constant 0 : index
    %c0_35 = arith.constant 0 : index
    %61 = vector.load %arg3[%c3_33, %c0_34, %c0_35] : memref<4x48x64xf32, #tpu.memory_space<vmem>>, vector<1x48x64xf32>
    %62 = vector.shape_cast %61 : vector<1x48x64xf32> to vector<48x64xf32>
    %cst_36 = arith.constant dense<0.000000e+00> : vector<128x64xf32>
    %63 = tpu.matmul %60, %62, %cst_36 {dimension_numbers = #tpu.dot_dimension_numbers<[1], [0], [0], [1], [0, 0, 1, 1], [], []>} : vector<128x48xf32>, vector<48x64xf32>, vector<128x64xf32> -> vector<128x64xf32>
    %64 = arith.addf %48, %63 : vector<128x64xf32>
    %c0_37 = arith.constant 0 : index
    %c0_38 = arith.constant 0 : index
    %65 = vector.load %arg4[%c0_37, %c0_38] : memref<128x64xf32, #tpu.memory_space<vmem>>, vector<128x64xf32>
    tpu.vector_store %arg4[%c0_37, %c0_38], %64 {strides = array<i32>} : memref<128x64xf32, #tpu.memory_space<vmem>>, vector<128x64xf32>,
    return
  }
  func.func @transform_0(%arg0: i32) -> (i32, i32) {
    %c0_i32 = arith.constant 0 : i32
    %c0_i32_0 = arith.constant 0 : i32
    return %arg0, %c0_i32 : i32, i32
  }
  func.func @transform_1(%arg0: i32) -> (i32, i32, i32) {
    %c0_i32 = arith.constant 0 : i32
    %c0_i32_0 = arith.constant 0 : i32
    %c0_i32_1 = arith.constant 0 : i32
    %c0_i32_2 = arith.constant 0 : i32
    return %c0_i32, %c0_i32_0, %c0_i32_1 : i32, i32, i32
  }
  func.func @transform_2(%arg0: i32) -> (i32, i32, i32) {
    %c0_i32 = arith.constant 0 : i32
    %c0_i32_0 = arith.constant 0 : i32
    %c0_i32_1 = arith.constant 0 : i32
    %c0_i32_2 = arith.constant 0 : i32
    return %c0_i32, %c0_i32_0, %c0_i32_1 : i32, i32, i32
  }
  func.func @transform_3(%arg0: i32) -> (i32, i32) {
    %c0_i32 = arith.constant 0 : i32
    %c0_i32_0 = arith.constant 0 : i32
    return %arg0, %c0_i32 : i32, i32
  }
}

</mosaic_0001>

<bundles_post_ra>
// kernel: tpu_custom_call.1
= control target key start
LH: loop header
LB: loop body
LE: loop exit
PB: predicated region body
PF: predicated region fallthrough
CT: control target
= control target key end

     0   :  { %s3460_s12 = smov 0   ;;  %s4662_s0 = inlined_call_operand.vmem [shape: f32[256,64], index: 0, kind: input, shape index: {}, may-alias: {0,3}]   ;;  %s4663_s1 = inlined_call_operand.vmem [shape: f32[4,64,48], index: 1, kind: input, shape index: {}]   ;;  %s4664_s2 = inlined_call_operand.vmem [shape: f32[4,48,64], index: 2, kind: input, shape index: {}]   ;;  %s4665_s3 = inlined_call_operand.vmem [shape: f32[256,64], index: 3, kind: output, shape index: {}, may-alias: {0,3}]  }
   0x1 LB: > { %s2494_s13 = sadd.s32 4294967295, %s3438_s12   ;;  %p2498_p0 = scmp.ge.s32.totalorder %s3438_s12, 1  ;;  %s3438_s12 = sphi %s3460_s12, %s13_s12  }
   0x2   : > { %p138_p1 = scmp.lt.s32.totalorder %s3438_s12, 3 }
   0x4   : > { %p139_p2 = pnand %p2498_p0, %p138_p1 }
   0x6   : > { %142 = sbr.rel (%p139_p2) target bundleno = 1376 (0x560), region = 32 }
   0xb   : > { %v197_v0 = vld [vmem:[%s4663_s1 + $0x38] sm:$0xff]  ;;  %v196_v1 = vld [vmem:[%s4663_s1 + $0x30] sm:$0xff]  ;;  %s2499_s18 = sshll.u32 %s2494_s13, 4  ;;  %v195_v2 = vld [vmem:[%s4663_s1 + $0x28] sm:$0xff]  ;;  %vm198_vm0 = vcmask 523264   ;;  %vm392_vm1 = vcmask 392192  }
   0xc   : > { %2859 = vmatprep.subr.mxu0 %v197_v0  ;;  %p163_p3 = scmp.lt.s32.totalorder %s2499_s18, 31  ;;  %v194_v3 = vld [vmem:[%s4663_s1 + $0x20] sm:$0xff]  ;;  %v193_v4 = vld [vmem:[%s4663_s1 + $0x18] sm:$0xff]  ;;  %v192_v6 = vld [vmem:[%s4663_s1 + $0x10] sm:$0xff] }
   0xd   : > { %2860 = vmatpush3.msra.mxu0 %v197_v0  ;;  %v191_v7 = vld [vmem:[%s4663_s1 + $0x8] sm:$0xff]  ;;  %v190_v8 = vld [vmem:[%s4663_s1] sm:$0xff] }
   0xe   : > { %2861 = vmatprep.subr.mxu0 %v196_v1  ;;  %s4730_s18 = smov (!%p163_p3, %s2499_s18), 31 }
   0xf   : > { %2862 = vmatpush3.msra.mxu0 %v196_v1  ;;  %s2500_s23 = sshll.u32 %s4730_s18, 3 }
  0x10   : > { %2863 = vmatprep.subr.mxu0 %v195_v2  ;;  %s3491_s28 = scalar_lea.vmem %s4662_s0, %s2500_s23  ;;  %s4581_s15 = scalar_lea.vmem %s4665_s3, %s2500_s23 }
  0x11   : > { %2864 = vmatpush3.msra.mxu0 %v195_v2  ;;  %v3494_v5 = vld [vmem:[%s3491_s28] sm:$0xff]  ;;  %v3508_v9 = vld [vmem:[%s3491_s28 + $0x8] sm:$0xff]  ;;  %v3511_v10 = vld [vmem:[%s3491_s28 + $0x10] sm:$0xff] }
  0x12   : > { %2865 = vmatprep.subr.mxu0 %v194_v3  ;;  %2875 = vmatprep.mubr.msk.f32.mxu0 %vm198_vm0, %v3494_v5  ;;  %v3518_v11 = vld [vmem:[%s3491_s28 + $0x18] sm:$0xff]  ;;  %v3521_v12 = vld [vmem:[%s3491_s28 + $0x20] sm:$0xff]  ;;  %v3528_v13 = vld [vmem:[%s3491_s28 + $0x28] sm:$0xff] }
  0x13   : > { %2866 = vmatpush3.msra.mxu0 %v194_v3  ;;  %4677 = vst [vmem:[#allocation2_spill] sm:$0xff] %v3521_v12  ;;  %v3531_v14 = vld [vmem:[%s3491_s28 + $0x30] sm:$0xff]  ;;  %v3538_v15 = vld [vmem:[%s3491_s28 + $0x38] sm:$0xff]  ;;  %v3541_v16 = vld [vmem:[%s3491_s28 + $0x40] sm:$0xff] }
  0x14   : > { %2867 = vmatprep.subr.mxu0 %v193_v4  ;;  %4678 = vst [vmem:[#allocation3_spill] sm:$0xff] %v3531_v14  ;;  %4679 = vst [vmem:[#allocation4_spill] sm:$0xff] %v3538_v15  ;;  %v3548_v17 = vld [vmem:[%s3491_s28 + $0x48] sm:$0xff]  ;;  %v3551_v18 = vld [vmem:[%s3491_s28 + $0x50] sm:$0xff] }
  0x15   : > { %2868 = vmatpush3.msra.mxu0 %v193_v4  ;;  %4680 = vst [vmem:[#allocation5_spill] sm:$0xff] %v3541_v16  ;;  %4681 = vst [vmem:[#allocation6_spill] sm:$0xff] %v3548_v17  ;;  %v3558_v19 = vld [vmem:[%s3491_s28 + $0x58] sm:$0xff]  ;;  %v3561_v20 = vld [vmem:[%s3491_s28 + $0x60] sm:$0xff] }
  0x16   : > { %2869 = vmatprep.subr.mxu0 %v192_v6  ;;  %4682 = vst [vmem:[#allocation7_spill] sm:$0xff] %v3551_v18  ;;  %4683 = vst [vmem:[#allocation8_spill] sm:$0xff] %v3558_v19  ;;  %v3568_v21 = vld [vmem:[%s3491_s28 + $0x68] sm:$0xff]  ;;  %v3571_v22 = vld [vmem:[%s3491_s28 + $0x70] sm:$0xff] }
  0x17   : > { %2870 = vmatpush3.msra.mxu0 %v192_v6  ;;  %4684 = vst [vmem:[#allocation9_spill] sm:$0xff] %v3561_v20  ;;  %4685 = vst [vmem:[#allocation10_spill] sm:$0xff] %v3568_v21  ;;  %v3578_v23 = vld [vmem:[%s3491_s28 + $0x78] sm:$0xff] }
  0x18   : > { %2871 = vmatprep.subr.mxu0 %v191_v7  ;;  %4686 = vst [vmem:[#allocation11_spill] sm:$0xff] %v3571_v22  ;;  %4687 = vst [vmem:[#allocation12_spill] sm:$0xff] %v3578_v23 }
  0x19   : > { %2872 = vmatpush3.msra.mxu0 %v191_v7 }
  0x1a   : > { %2873 = vmatprep.subr.mxu0 %v190_v8 }
  0x1b   : > { %2874 = vmatpush3.msra.mxu0 %v190_v8 }
  0x1c   : > { %2876 = vmatmul.mubr.msk.f32.vlgmr.msra.gmra.mxu0 %vm198_vm0, %v3508_v9 }
  0x1d   : > { %2878 = vmatprep.mubr.msk.f32.mxu0 %vm198_vm0, %v3511_v10 }
  0x20   : > { %2879 = vmatmul.mubr.msk.f32.gmra.mxu0 %vm198_vm0, %v3518_v11 }
  0x21   : > { %2881 = vmatprep.mubr.msk.f32.mxu0 %vm198_vm0, %v3521_v12 }
  0x24   : > { %2882 = vmatmul.mubr.msk.f32.gmra.mxu0 %vm198_vm0, %v3528_v13 }
  0x25   : > { %2884 = vmatprep.mubr.msk.f32.mxu0 %vm198_vm0, %v3531_v14 }
  0x28   : > { %2885 = vmatmul.mubr.msk.f32.gmra.mxu0 %vm198_vm0, %v3538_v15 }
  0x29   : > { %2887 = vmatprep.mubr.msk.f32.mxu0 %vm198_vm0, %v3541_v16 }
  0x2c   : > { %2888 = vmatmul.mubr.msk.f32.gmra.mxu0 %vm198_vm0, %v3548_v17 }
  0x2d   : > { %2890 = vmatprep.mubr.msk.f32.mxu0 %vm198_vm0, %v3551_v18 }
  0x30   : > { %2891 = vmatmul.mubr.msk.f32.gmra.mxu0 %vm198_vm0, %v3558_v19 }
  0x31   : > { %2893 = vmatprep.mubr.msk.f32.mxu0 %vm198_vm0, %v3561_v20 }
  0x34   : > { %2894 = vmatmul.mubr.msk.f32.gmra.mxu0 %vm198_vm0, %v3568_v21 }
  0x35   : > { %2896 = vmatprep.mubr.msk.f32.mxu0 %vm198_vm0, %v3571_v22 }
  0x38   : > { %2897 = vmatmul.mubr.msk.f32.gmra.mxu0 %vm198_vm0, %v3578_v23 }
  0xdc   : > { %v2877_v24 = vpop.f32.mrf.mxu0 }
  0xdd   : > { %v396_v29 = vsel %vm392_vm1, %v2877_v24, -inf }
  0xde   : > { %v313_v25 = vpop.f32.mrf.mxu0 }
  0xdf   : > { %v393_v26 = vsel %vm392_vm1, %v313_v25, -inf }
  0xe0   : > { %394 = vmax.xlane.f32.xlu0 %v393_v26  ;;  %v2880_v27 = vpop.f32.mrf.mxu0 }
  0xe1   : > { %v402_v33 = vsel %vm392_vm1, %v2880_v27, -inf }
  0xe2   : > { %v323_v28 = vpop.f32.mrf.mxu0 }
  0xe3   : > { %v399_v30 = vsel %vm392_vm1, %v323_v28, -inf }
  0xe4   : > { %397 = vmax.xlane.f32.xlu0 %v396_v29  ;;  %400 = vmax.xlane.f32.xlu1 %v399_v30  ;;  %v2883_v31 = vpop.f32.mrf.mxu0 }
  0xe5   : > { %v408_v37 = vsel %vm392_vm1, %v2883_v31, -inf }
  0xe6   : > { %v333_v32 = vpop.f32.mrf.mxu0 }
  0xe7   : > { %v405_v34 = vsel %vm392_vm1, %v333_v32, -inf }
  0xe8   : > { %403 = vmax.xlane.f32.xlu1 %v402_v33  ;;  %406 = vmax.xlane.f32.xlu0 %v405_v34  ;;  %v3587_v35 = vpop.f32.mrf.mxu0 }
  0xe9   : > { %v414_v41 = vsel %vm392_vm1, %v3587_v35, -inf }
  0xea   : > { %v343_v36 = vpop.f32.mrf.mxu0 }
  0xeb   : > { %v411_v38 = vsel %vm392_vm1, %v343_v36, -inf }
  0xec   : > { %409 = vmax.xlane.f32.xlu1 %v408_v37  ;;  %412 = vmax.xlane.f32.xlu0 %v411_v38  ;;  %v3591_v39 = vpop.f32.mrf.mxu0 }
  0xed   : > { %v420_v45 = vsel %vm392_vm1, %v3591_v39, -inf }
  0xee   : > { %v353_v40 = vpop.f32.mrf.mxu0 }
  0xef   : > { %v417_v42 = vsel %vm392_vm1, %v353_v40, -inf }
  0xf0   : > { %415 = vmax.xlane.f32.xlu1 %v414_v41  ;;  %418 = vmax.xlane.f32.xlu0 %v417_v42  ;;  %v3596_v43 = vpop.f32.mrf.mxu0 }
  0xf1   : > { %v426_v49 = vsel %vm392_vm1, %v3596_v43, -inf }
  0xf2   : > { %v3598_v44 = vpop.f32.mrf.mxu0 }
  0xf3   : > { %v423_v46 = vsel %vm392_vm1, %v3598_v44, -inf }
  0xf4   : > { %421 = vmax.xlane.f32.xlu1 %v420_v45  ;;  %424 = vmax.xlane.f32.xlu0 %v423_v46  ;;  %v3604_v47 = vpop.f32.mrf.mxu0 }
  0xf5   : > { %v432_v53 = vsel %vm392_vm1, %v3604_v47, -inf }
  0xf6   : > { %v3606_v48 = vpop.f32.mrf.mxu0 }
  0xf7   : > { %v429_v50 = vsel %vm392_vm1, %v3606_v48, -inf }
  0xf8   : > { %427 = vmax.xlane.f32.xlu1 %v426_v49  ;;  %430 = vmax.xlane.f32.xlu0 %v429_v50  ;;  %v3612_v51 = vpop.f32.mrf.mxu0 }
  0xf9   : > { %v438_v55 = vsel %vm392_vm1, %v3612_v51, -inf }
  0xfa   : > { %v3614_v52 = vpop.f32.mrf.mxu0 }
  0xfb   : > { %v435_v54 = vsel %vm392_vm1, %v3614_v52, -inf }
  0xfc   : > { %433 = vmax.xlane.f32.xlu1 %v432_v53  ;;  %436 = vmax.xlane.f32.xlu0 %v435_v54 }
 0x100   : > { %439 = vmax.xlane.f32.xlu1 %v438_v55 }
 0x169   : > { %v395_v56 = vpop.xlane.xlu0 %394 }
 0x16a   : > { %v441_v57 = vsub.f32 %v313_v25, %v395_v56 }
 0x16c   : > { %v457_v58 = vmul.f32 1.442695, %v441_v57 }
 0x16d   : > { %v398_v59 = vpop.xlane.xlu0 %397  ;;  %v401_v60 = vpop.xlane.xlu1 %400 }
 0x16e   : > { %3171 = vpow2.f32 %v457_v58  ;;  %v442_v61 = vsub.f32 %v2877_v24, %v398_v59  ;;  %v443_v62 = vsub.f32 %v323_v28, %v401_v60 }
 0x170   : > { %v459_v63 = vmul.f32 1.442695, %v442_v61  ;;  %v461_v0 = vmul.f32 1.442695, %v443_v62 }
 0x171   : > { %v404_v1 = vpop.xlane.xlu1 %403  ;;  %v407_v2 = vpop.xlane.xlu0 %406 }
 0x172   : > { %3173 = vpow2.f32 %v459_v63  ;;  %v444_v3 = vsub.f32 %v2880_v27, %v404_v1  ;;  %v445_v4 = vsub.f32 %v333_v32, %v407_v2 }
 0x173   : > { %3175 = vpow2.f32 %v461_v0 }
 0x174   : > { %v463_v6 = vmul.f32 1.442695, %v444_v3  ;;  %v465_v7 = vmul.f32 1.442695, %v445_v4 }
 0x175   : > { %v410_v8 = vpop.xlane.xlu1 %409  ;;  %v413_v26 = vpop.xlane.xlu0 %412 }
 0x176   : > { %3177 = vpow2.f32 %v463_v6  ;;  %v446_v25 = vsub.f32 %v2883_v31, %v410_v8  ;;  %v447_v29 = vsub.f32 %v343_v36, %v413_v26 }
 0x177   : > { %3179 = vpow2.f32 %v465_v7 }
 0x178   : > { %v467_v30 = vmul.f32 1.442695, %v446_v25  ;;  %v469_v33 = vmul.f32 1.442695, %v447_v29  ;;  %v574_v29 = vld [vmem:[%s4664_s2 + $0x28] sm:$0xff] }
 0x179   : > { %v416_v24 = vpop.xlane.xlu1 %415  ;;  %v419_v28 = vpop.xlane.xlu0 %418  ;;  %2899 = vmatprep.subr.mxu1 %v574_v29 }
 0x17a   : > { %3181 = vpow2.f32 %v467_v30  ;;  %v448_v34 = vsub.f32 %v3587_v35, %v416_v24  ;;  %v449_v37 = vsub.f32 %v353_v40, %v419_v28  ;;  %2900 = vmatpush3.msra.mxu1 %v574_v29  ;;  %v573_v28 = vld [vmem:[%s4664_s2 + $0x20] sm:$0xff] }
 0x17b   : > { %v3623_v38 = vpop.eup %3171  ;;  %3183 = vpow2.f32 %v469_v33  ;;  %2901 = vmatprep.subr.mxu1 %v573_v28 }
 0x17c   : > { %v471_v27 = vmul.f32 1.442695, %v448_v34  ;;  %v473_v32 = vmul.f32 1.442695, %v449_v37  ;;  %v489_v41 = vsel %vm392_vm1, %v3623_v38, 0.0  ;;  %v572_v34 = vld [vmem:[%s4664_s2 + $0x18] sm:$0xff]  ;;  %2902 = vmatpush3.msra.mxu1 %v573_v28 }
 0x17d   : > { %v422_v42 = vpop.xlane.xlu1 %421  ;;  %v425_v31 = vpop.xlane.xlu0 %424  ;;  %490 = vadd.xlane.f32.xlu0 %v489_v41  ;;  %2903 = vmatprep.subr.mxu1 %v572_v34 }
 0x17e   : > { %3185 = vpow2.f32 %v471_v27  ;;  %v450_v36 = vsub.f32 %v3591_v39, %v422_v42  ;;  %v451_v45 = vsub.f32 %v3598_v44, %v425_v31  ;;  %2904 = vmatpush3.msra.mxu1 %v572_v34  ;;  %v571_v42 = vld [vmem:[%s4664_s2 + $0x10] sm:$0xff]  ;;  %v570_v31 = vld [vmem:[%s4664_s2 + $0x8] sm:$0xff]  ;;  %v2539_v34 = vld [vmem:[%s4663_s1 + $0x60] sm:$0xff] }
 0x17f   : > { %v3629_v46 = vpop.eup %3173  ;;  %3187 = vpow2.f32 %v473_v32  ;;  %2905 = vmatprep.subr.mxu1 %v571_v42 }
 0x180   : > { %v3631_v35 = vpop.eup %3175  ;;  %v475_v40 = vmul.f32 1.442695, %v450_v36  ;;  %v477_v49 = vmul.f32 1.442695, %v451_v45  ;;  %v492_v50 = vsel %vm392_vm1, %v3629_v46, 0.0  ;;  %2906 = vmatpush3.msra.mxu1 %v571_v42 }
 0x181   : > { %v428_v53 = vpop.xlane.xlu1 %427  ;;  %v431_v54 = vpop.xlane.xlu0 %430  ;;  %493 = vadd.xlane.f32.xlu1 %v492_v50  ;;  %v495_v55 = vsel %vm392_vm1, %v3631_v35, 0.0  ;;  %2907 = vmatprep.subr.mxu1 %v570_v31  ;;  %v569_v50 = vld [vmem:[%s4664_s2] sm:$0xff] }
 0x182   : > { %3189 = vpow2.f32 %v475_v40  ;;  %v452_v39 = vsub.f32 %v3596_v43, %v428_v53  ;;  %v453_v44 = vsub.f32 %v3606_v48, %v431_v54  ;;  %496 = vadd.xlane.f32.xlu0 %v495_v55  ;;  %2908 = vmatpush3.msra.mxu1 %v570_v31  ;;  %v2542_v53 = vld [vmem:[%s4663_s1 + $0x78] sm:$0xff] }
 0x183   : > { %v3639_v56 = vpop.eup %3177  ;;  %3191 = vpow2.f32 %v477_v49  ;;  %2909 = vmatprep.subr.mxu1 %v569_v50 }
 0x184   : > { %v3641_v57 = vpop.eup %3179  ;;  %v479_v58 = vmul.f32 1.442695, %v452_v39  ;;  %v481_v59 = vmul.f32 1.442695, %v453_v44  ;;  %v498_v60 = vsel %vm392_vm1, %v3639_v56, 0.0  ;;  %2910 = vmatpush3.msra.mxu1 %v569_v50 }
 0x185   : > { %v434_v61 = vpop.xlane.xlu1 %433  ;;  %499 = vadd.xlane.f32.xlu1 %v498_v60  ;;  %v501_v62 = vsel %vm392_vm1, %v3641_v57, 0.0  ;;  %v437_v63 = vpop.xlane.xlu0 %436  ;;  %2935 = vmatprep.subr.mxu1 %v2542_v53 }
 0x186   : > { %3193 = vpow2.f32 %v479_v58  ;;  %v454_v43 = vsub.f32 %v3604_v47, %v434_v61  ;;  %502 = vadd.xlane.f32.xlu0 %v501_v62  ;;  %v455_v48 = vsub.f32 %v3614_v52, %v437_v63 }
 0x187   : > { %v3649_v0 = vpop.eup %3181  ;;  %3195 = vpow2.f32 %v481_v59 }
 0x188   : > { %v3651_v1 = vpop.eup %3183  ;;  %v483_v2 = vmul.f32 1.442695, %v454_v43  ;;  %v485_v3 = vmul.f32 1.442695, %v455_v48  ;;  %v504_v4 = vsel %vm392_vm1, %v3649_v0, 0.0 }
 0x189   : > { %505 = vadd.xlane.f32.xlu1 %v504_v4  ;;  %v440_v6 = vpop.xlane.xlu1 %439  ;;  %v507_v7 = vsel %vm392_vm1, %v3651_v1, 0.0 }
 0x18a   : > { %3197 = vpow2.f32 %v483_v2  ;;  %v456_v47 = vsub.f32 %v3612_v51, %v440_v6  ;;  %508 = vadd.xlane.f32.xlu0 %v507_v7 }
 0x18b   : > { %v3658_v52 = vpop.eup %3185  ;;  %3199 = vpow2.f32 %v485_v3 }
 0x18c   : > { %v3660_v8 = vpop.eup %3187  ;;  %v487_v26 = vmul.f32 1.442695, %v456_v47  ;;  %v510_v25 = vsel %vm392_vm1, %v3658_v52, 0.0 }
 0x18d   : > { %511 = vadd.xlane.f32.xlu1 %v510_v25  ;;  %v513_v30 = vsel %vm392_vm1, %v3660_v8, 0.0  ;;  %v2541_v25 = vld [vmem:[%s4663_s1 + $0x70] sm:$0xff] }
 0x18e   : > { %3201 = vpow2.f32 %v487_v26  ;;  %514 = vadd.xlane.f32.xlu0 %v513_v30 }
 0x18f   : > { %v3669_v51 = vpop.eup %3189 }
 0x190   : > { %v3671_v33 = vpop.eup %3191  ;;  %v516_v24 = vsel %vm392_vm1, %v3669_v51, 0.0 }
 0x191   : > { %517 = vadd.xlane.f32.xlu1 %v516_v24  ;;  %v519_v37 = vsel %vm392_vm1, %v3671_v33, 0.0 }
 0x192   : > { %520 = vadd.xlane.f32.xlu0 %v519_v37 }
 0x193   : > { %v3683_v27 = vpop.eup %3193 }
 0x194   : > { %v3685_v32 = vpop.eup %3195  ;;  %v522_v41 = vsel %vm392_vm1, %v3683_v27, 0.0 }
 0x195   : > { %523 = vadd.xlane.f32.xlu1 %v522_v41  ;;  %v525_v36 = vsel %vm392_vm1, %v3685_v32, 0.0 }
 0x196   : > { %526 = vadd.xlane.f32.xlu0 %v525_v36 }
 0x197   : > { %v3697_v45 = vpop.eup %3197 }
 0x198   : > { %v3699_v40 = vpop.eup %3199  ;;  %v528_v49 = vsel %vm392_vm1, %v3697_v45, 0.0 }
 0x199   : > { %529 = vadd.xlane.f32.xlu1 %v528_v49  ;;  %v531_v54 = vsel %vm392_vm1, %v3699_v40, 0.0  ;;  %v2537_v49 = vld [vmem:[%s4663_s1 + $0x50] sm:$0xff] }
 0x19a   : > { %532 = vadd.xlane.f32.xlu0 %v531_v54 }
 0x19b   : > { %v3711_v55 = vpop.eup %3201 }
 0x19c   : > { %v534_v39 = vsel %vm392_vm1, %v3711_v55, 0.0 }
 0x19d   : > { %535 = vadd.xlane.f32.xlu1 %v534_v39 }
 0x206   : > { %v491_v44 = vpop.xlane.xlu0 %490 }
 0x207   : > { %3203 = vrcp.f32 %v491_v44 }
 0x20a   : > { %v494_v58 = vpop.xlane.xlu1 %493 }
 0x20b   : > { %3205 = vrcp.f32 %v494_v58  ;;  %v497_v59 = vpop.xlane.xlu0 %496  ;;  %v2535_v58 = vld [vmem:[%s4663_s1 + $0x40] sm:$0xff] }
 0x20c   : > { %3207 = vrcp.f32 %v497_v59 }
 0x20e   : > { %v500_v60 = vpop.xlane.xlu1 %499 }
 0x20f   : > { %3209 = vrcp.f32 %v500_v60  ;;  %v503_v61 = vpop.xlane.xlu0 %502 }
 0x210   : > { %3211 = vrcp.f32 %v503_v61 }
 0x212   : > { %v506_v62 = vpop.xlane.xlu1 %505 }
 0x213   : > { %3213 = vrcp.f32 %v506_v62  ;;  %v509_v63 = vpop.xlane.xlu0 %508 }
 0x214   : > { %v3204_v43 = vpop.eup %3203  ;;  %3215 = vrcp.f32 %v509_v63 }
 0x215   : > { %v538_v48 = vmul.f32 %v3204_v43, %v3623_v38 }
 0x216   : > { %v512_v2 = vpop.xlane.xlu1 %511 }
 0x217   : > { %3217 = vrcp.f32 %v512_v2  ;;  %v515_v3 = vpop.xlane.xlu0 %514  ;;  %2911 = vmatprep.mubr.msk.f32.mxu1 %vm392_vm1, %v538_v48 }
 0x218   : > { %v3206_v4 = vpop.eup %3205  ;;  %3219 = vrcp.f32 %v515_v3 }
 0x219   : > { %v3208_v6 = vpop.eup %3207  ;;  %v540_v7 = vmul.f32 %v3206_v4, %v3629_v46  ;;  %v2540_v46 = vld [vmem:[%s4663_s1 + $0x68] sm:$0xff] }
 0x21a   : > { %v518_v47 = vpop.xlane.xlu1 %517  ;;  %v542_v26 = vmul.f32 %v3208_v6, %v3631_v35 }
 0x21b   : > { %3221 = vrcp.f32 %v518_v47  ;;  %v521_v29 = vpop.xlane.xlu0 %520  ;;  %2912 = vmatmul.mubr.msk.f32.vlgmr.msra.gmra.mxu1 %vm392_vm1, %v540_v7  ;;  %v2582_v7 = vld [vmem:[%s4663_s1 + $0x88] sm:$0xff]  ;;  %v2581_v47 = vld [vmem:[%s4663_s1 + $0x80] sm:$0xff] }
 0x21c   : > { %v3210_v38 = vpop.eup %3209  ;;  %3223 = vrcp.f32 %v521_v29  ;;  %2936 = vmatpush3.msra.mxu1 %v2542_v53  ;;  %2914 = vmatprep.mubr.msk.f32.mxu1 %vm392_vm1, %v542_v26  ;;  %v2634_v26 = vld [vmem:[%s4663_s1 + $0xf8] sm:$0xff]  ;;  %v2632_v29 = vld [vmem:[%s4663_s1 + $0xe8] sm:$0xff] }
 0x21d   : > { %v3212_v30 = vpop.eup %3211  ;;  %2937 = vmatprep.subr.mxu1 %v2541_v25  ;;  %v544_v35 = vmul.f32 %v3210_v38, %v3639_v56  ;;  %v2538_v56 = vld [vmem:[%s4663_s1 + $0x58] sm:$0xff]  ;;  %v2631_v38 = vld [vmem:[%s4663_s1 + $0xe0] sm:$0xff] }
 0x21e   : > { %v524_v24 = vpop.xlane.xlu1 %523  ;;  %2938 = vmatpush3.msra.mxu1 %v2541_v25  ;;  %v546_v28 = vmul.f32 %v3212_v30, %v3641_v57  ;;  %v2633_v25 = vld [vmem:[%s4663_s1 + $0xf0] sm:$0xff] }
 0x21f   : > { %3225 = vrcp.f32 %v524_v24  ;;  %v527_v37 = vpop.xlane.xlu0 %526  ;;  %2915 = vmatmul.mubr.msk.f32.gmra.mxu1 %vm392_vm1, %v544_v35  ;;  %2939 = vmatprep.subr.mxu1 %v2540_v46  ;;  %v2629_v30 = vld [vmem:[%s4663_s1 + $0xd0] sm:$0xff]  ;;  %v2628_v35 = vld [vmem:[%s4663_s1 + $0xc8] sm:$0xff]  ;;  %v2627_v24 = vld [vmem:[%s4663_s1 + $0xc0] sm:$0xff] }
 0x220   : > { %v3214_v41 = vpop.eup %3213  ;;  %3227 = vrcp.f32 %v527_v37  ;;  %2917 = vmatprep.mubr.msk.f32.mxu1 %vm392_vm1, %v546_v28  ;;  %2940 = vmatpush3.msra.mxu1 %v2540_v46  ;;  %v2630_v46 = vld [vmem:[%s4663_s1 + $0xd8] sm:$0xff] }
 0x221   : > { %v3216_v42 = vpop.eup %3215  ;;  %v548_v57 = vmul.f32 %v3214_v41, %v3649_v0  ;;  %2941 = vmatprep.subr.mxu1 %v2539_v34  ;;  %v2536_v0 = vld [vmem:[%s4663_s1 + $0x48] sm:$0xff] }
 0x222   : > { %v530_v31 = vpop.xlane.xlu1 %529  ;;  %v550_v36 = vmul.f32 %v3216_v42, %v3651_v1  ;;  %2942 = vmatpush3.msra.mxu1 %v2539_v34 }
 0x223   : > { %3229 = vrcp.f32 %v530_v31  ;;  %v533_v50 = vpop.xlane.xlu0 %532  ;;  %2918 = vmatmul.mubr.msk.f32.gmra.mxu1 %vm392_vm1, %v548_v57  ;;  %2943 = vmatprep.subr.mxu1 %v2538_v56 }
 0x224   : > { %v3218_v53 = vpop.eup %3217  ;;  %3231 = vrcp.f32 %v533_v50  ;;  %2920 = vmatprep.mubr.msk.f32.mxu1 %vm392_vm1, %v550_v36  ;;  %2944 = vmatpush3.msra.mxu1 %v2538_v56 }
 0x225   : > { %v3220_v1 = vpop.eup %3219  ;;  %v552_v54 = vmul.f32 %v3218_v53, %v3658_v52  ;;  %2945 = vmatprep.subr.mxu1 %v2537_v49  ;;  %v2588_v52 = vld [vmem:[%s4663_s1 + $0xb8] sm:$0xff] }
 0x226   : > { %v536_v39 = vpop.xlane.xlu1 %535  ;;  %v554_v44 = vmul.f32 %v3220_v1, %v3660_v8  ;;  %2946 = vmatpush3.msra.mxu1 %v2537_v49 }
 0x227   : > { %3233 = vrcp.f32 %v536_v39  ;;  %2921 = vmatmul.mubr.msk.f32.gmra.mxu1 %vm392_vm1, %v552_v54  ;;  %2947 = vmatprep.subr.mxu1 %v2536_v0 }
 0x228   : > { %v3222_v59 = vpop.eup %3221  ;;  %2923 = vmatprep.mubr.msk.f32.mxu1 %vm392_vm1, %v554_v44  ;;  %2948 = vmatpush3.msra.mxu1 %v2536_v0 }
 0x229   : > { %v3224_v60 = vpop.eup %3223  ;;  %v556_v8 = vmul.f32 %v3222_v59, %v3669_v51  ;;  %2949 = vmatprep.subr.mxu1 %v2535_v58 }
 0x22a   : > { %v558_v61 = vmul.f32 %v3224_v60, %v3671_v33  ;;  %2950 = vmatpush3.msra.mxu1 %v2535_v58 }
 0x22b   : > { %2924 = vmatmul.mubr.msk.f32.gmra.mxu1 %vm392_vm1, %v556_v8  ;;  %3011 = vmatprep.subr.mxu1 %v2588_v52 }
 0x22c   : > { %v3226_v62 = vpop.eup %3225  ;;  %2926 = vmatprep.mubr.msk.f32.mxu1 %vm392_vm1, %v558_v61 }
 0x22d   : > { %v3228_v63 = vpop.eup %3227  ;;  %v560_v43 = vmul.f32 %v3226_v62, %v3683_v27  ;;  %v2587_v27 = vld [vmem:[%s4663_s1 + $0xb0] sm:$0xff] }
 0x22e   : > { %v562_v48 = vmul.f32 %v3228_v63, %v3685_v32  ;;  %v2586_v32 = vld [vmem:[%s4663_s1 + $0xa8] sm:$0xff] }
 0x22f   : > { %2927 = vmatmul.mubr.msk.f32.gmra.mxu1 %vm392_vm1, %v560_v43 }
 0x230   : > { %v3230_v2 = vpop.eup %3229  ;;  %2929 = vmatprep.mubr.msk.f32.mxu1 %vm392_vm1, %v562_v48 }
 0x231   : > { %v3232_v51 = vpop.eup %3231  ;;  %v564_v33 = vmul.f32 %v3230_v2, %v3697_v45  ;;  %v2585_v45 = vld [vmem:[%s4663_s1 + $0xa0] sm:$0xff] }
 0x232   : > { %v566_v3 = vmul.f32 %v3232_v51, %v3699_v40  ;;  %v2584_v40 = vld [vmem:[%s4663_s1 + $0x98] sm:$0xff] }
 0x233   : > { %2930 = vmatmul.mubr.msk.f32.gmra.mxu1 %vm392_vm1, %v564_v33 }
 0x234   : > { %v3234_v4 = vpop.eup %3233  ;;  %2932 = vmatprep.mubr.msk.f32.mxu1 %vm392_vm1, %v566_v3 }
 0x235   : > { %v568_v6 = vmul.f32 %v3234_v4, %v3711_v55  ;;  %v2583_v55 = vld [vmem:[%s4663_s1 + $0x90] sm:$0xff] }
 0x237   : > { %2933 = vmatmul.mubr.msk.f32.gmra.mxu1 %vm392_vm1, %v568_v6 }
 0x238   : > { %2951 = vmatprep.mubr.msk.f32.mxu1 %vm198_vm0, %v3494_v5 }
 0x23b   : > { %2952 = vmatmul.mubr.msk.f32.vlgmr.msra.gmra.mxu1 %vm198_vm0, %v3508_v9 }
 0x23c   : > { %3012 = vmatpush3.msra.mxu1 %v2588_v52  ;;  %2954 = vmatprep.mubr.msk.f32.mxu1 %vm198_vm0, %v3511_v10 }
 0x23d   : > { %3013 = vmatprep.subr.mxu1 %v2587_v27 }
 0x23e   : > { %3014 = vmatpush3.msra.mxu1 %v2587_v27 }
 0x23f   : > { %2955 = vmatmul.mubr.msk.f32.gmra.mxu1 %vm198_vm0, %v3518_v11  ;;  %3015 = vmatprep.subr.mxu1 %v2586_v32 }
 0x240   : > { %2957 = vmatprep.mubr.msk.f32.mxu1 %vm198_vm0, %v3521_v12  ;;  %3016 = vmatpush3.msra.mxu1 %v2586_v32 }
 0x241   : > { %3017 = vmatprep.subr.mxu1 %v2585_v45 }
 0x242   : > { %3018 = vmatpush3.msra.mxu1 %v2585_v45 }
 0x243   : > { %2958 = vmatmul.mubr.msk.f32.gmra.mxu1 %vm198_vm0, %v3528_v13  ;;  %3019 = vmatprep.subr.mxu1 %v2584_v40 }
 0x244   : > { %2960 = vmatprep.mubr.msk.f32.mxu1 %vm198_vm0, %v3531_v14  ;;  %3020 = vmatpush3.msra.mxu1 %v2584_v40 }
 0x245   : > { %3021 = vmatprep.subr.mxu1 %v2583_v55 }
 0x246   : > { %3022 = vmatpush3.msra.mxu1 %v2583_v55 }
 0x247   : > { %2961 = vmatmul.mubr.msk.f32.gmra.mxu1 %vm198_vm0, %v3538_v15  ;;  %3023 = vmatprep.subr.mxu1 %v2582_v7 }
 0x248   : > { %2963 = vmatprep.mubr.msk.f32.mxu1 %vm198_vm0, %v3541_v16  ;;  %3024 = vmatpush3.msra.mxu1 %v2582_v7 }
 0x249   : > { %3025 = vmatprep.subr.mxu1 %v2581_v47 }
 0x24a   : > { %3026 = vmatpush3.msra.mxu1 %v2581_v47 }
 0x24b   : > { %2964 = vmatmul.mubr.msk.f32.gmra.mxu1 %vm198_vm0, %v3548_v17  ;;  %3087 = vmatprep.subr.mxu1 %v2634_v26 }
 0x24c   : > { %2966 = vmatprep.mubr.msk.f32.mxu1 %vm198_vm0, %v3551_v18 }
 0x24f   : > { %2967 = vmatmul.mubr.msk.f32.gmra.mxu1 %vm198_vm0, %v3558_v19 }
 0x250   : > { %2969 = vmatprep.mubr.msk.f32.mxu1 %vm198_vm0, %v3561_v20 }
 0x253   : > { %2970 = vmatmul.mubr.msk.f32.gmra.mxu1 %vm198_vm0, %v3568_v21 }
 0x254   : > { %2972 = vmatprep.mubr.msk.f32.mxu1 %vm198_vm0, %v3571_v22 }
 0x257   : > { %2973 = vmatmul.mubr.msk.f32.gmra.mxu1 %vm198_vm0, %v3578_v23 }
 0x258   : > { %3027 = vmatprep.mubr.msk.f32.mxu1 %vm198_vm0, %v3494_v5 }
 0x25b   : > { %3028 = vmatmul.mubr.msk.f32.vlgmr.msra.gmra.mxu1 %vm198_vm0, %v3508_v9 }
 0x25c   : > { %3088 = vmatpush3.msra.mxu1 %v2634_v26  ;;  %3030 = vmatprep.mubr.msk.f32.mxu1 %vm198_vm0, %v3511_v10 }
 0x25d   : > { %3089 = vmatprep.subr.mxu1 %v2633_v25 }
 0x25e   : > { %3090 = vmatpush3.msra.mxu1 %v2633_v25 }
 0x25f   : > { %3031 = vmatmul.mubr.msk.f32.gmra.mxu1 %vm198_vm0, %v3518_v11  ;;  %3091 = vmatprep.subr.mxu1 %v2632_v29 }
 0x260   : > { %3033 = vmatprep.mubr.msk.f32.mxu1 %vm198_vm0, %v3521_v12  ;;  %3092 = vmatpush3.msra.mxu1 %v2632_v29 }
 0x261   : > { %3093 = vmatprep.subr.mxu1 %v2631_v38 }
 0x262   : > { %3094 = vmatpush3.msra.mxu1 %v2631_v38 }
 0x263   : > { %3034 = vmatmul.mubr.msk.f32.gmra.mxu1 %vm198_vm0, %v3528_v13  ;;  %3095 = vmatprep.subr.mxu1 %v2630_v46 }
 0x264   : > { %3036 = vmatprep.mubr.msk.f32.mxu1 %vm198_vm0, %v3531_v14  ;;  %3096 = vmatpush3.msra.mxu1 %v2630_v46 }
 0x265   : > { %3097 = vmatprep.subr.mxu1 %v2629_v30 }
 0x266   : > { %3098 = vmatpush3.msra.mxu1 %v2629_v30 }
 0x267   : > { %3037 = vmatmul.mubr.msk.f32.gmra.mxu1 %vm198_vm0, %v3538_v15  ;;  %3099 = vmatprep.subr.mxu1 %v2628_v35 }
 0x268   : > { %3039 = vmatprep.mubr.msk.f32.mxu1 %vm198_vm0, %v3541_v16  ;;  %3100 = vmatpush3.msra.mxu1 %v2628_v35 }
 0x269   : > { %3101 = vmatprep.subr.mxu1 %v2627_v24 }
 0x26a   : > { %3102 = vmatpush3.msra.mxu1 %v2627_v24 }
 0x26b   : > { %3040 = vmatmul.mubr.msk.f32.gmra.mxu1 %vm198_vm0, %v3548_v17 }
 0x26c   : > { %3042 = vmatprep.mubr.msk.f32.mxu1 %vm198_vm0, %v3551_v18 }
 0x26f   : > { %3043 = vmatmul.mubr.msk.f32.gmra.mxu1 %vm198_vm0, %v3558_v19 }
 0x270   : > { %3045 = vmatprep.mubr.msk.f32.mxu1 %vm198_vm0, %v3561_v20 }
 0x273   : > { %3046 = vmatmul.mubr.msk.f32.gmra.mxu1 %vm198_vm0, %v3568_v21 }
 0x274   : > { %3048 = vmatprep.mubr.msk.f32.mxu1 %vm198_vm0, %v3571_v22 }
 0x277   : > { %3049 = vmatmul.mubr.msk.f32.gmra.mxu1 %vm198_vm0, %v3578_v23 }
 0x278   : > { %3103 = vmatprep.mubr.msk.f32.mxu1 %vm198_vm0, %v3494_v5 }
 0x27b   : > { %3104 = vmatmul.mubr.msk.f32.vlgmr.msra.gmra.mxu1 %vm198_vm0, %v3508_v9 }
 0x27c   : > { %3106 = vmatprep.mubr.msk.f32.mxu1 %vm198_vm0, %v3511_v10 }
 0x27f   : > { %3107 = vmatmul.mubr.msk.f32.gmra.mxu1 %vm198_vm0, %v3518_v11 }
 0x280   : > { %3109 = vmatprep.mubr.msk.f32.mxu1 %vm198_vm0, %v3521_v12 }
 0x283   : > { %3110 = vmatmul.mubr.msk.f32.gmra.mxu1 %vm198_vm0, %v3528_v13 }
 0x284   : > { %3112 = vmatprep.mubr.msk.f32.mxu1 %vm198_vm0, %v3531_v14 }
 0x287   : > { %3113 = vmatmul.mubr.msk.f32.gmra.mxu1 %vm198_vm0, %v3538_v15 }
 0x288   : > { %3115 = vmatprep.mubr.msk.f32.mxu1 %vm198_vm0, %v3541_v16 }
 0x28b   : > { %3116 = vmatmul.mubr.msk.f32.gmra.mxu1 %vm198_vm0, %v3548_v17  ;;  %v2563_v17 = vld [vmem:[%s4664_s2 + $0x50] sm:$0xff] }
 0x28c   : > { %3118 = vmatprep.mubr.msk.f32.mxu1 %vm198_vm0, %v3551_v18 }
 0x28f   : > { %3119 = vmatmul.mubr.msk.f32.gmra.mxu1 %vm198_vm0, %v3558_v19 }
 0x290   : > { %3121 = vmatprep.mubr.msk.f32.mxu1 %vm198_vm0, %v3561_v20 }
 0x293   : > { %3122 = vmatmul.mubr.msk.f32.gmra.mxu1 %vm198_vm0, %v3568_v21 }
 0x294   : > { %3124 = vmatprep.mubr.msk.f32.mxu1 %vm198_vm0, %v3571_v22 }
 0x297   : > { %3125 = vmatmul.mubr.msk.f32.gmra.mxu1 %vm198_vm0, %v3578_v23 }
 0x2db   : > { %v3912_v5 = vpop.f32.mrf.mxu1 }
 0x2dd   : > { %v3914_v9 = vpop.f32.mrf.mxu1 }
 0x2de   : > { %4688 = vst [vmem:[#allocation13_spill] sm:$0xff] %v3914_v9 }
 0x2df   : > { %v3916_v10 = vpop.f32.mrf.mxu1 }
 0x2e0   : > { %4689 = vst [vmem:[#allocation14_spill] sm:$0xff] %v3916_v10 }
 0x2e1   : > { %v3918_v11 = vpop.f32.mrf.mxu1 }
 0x2e2   : > { %4690 = vst [vmem:[#allocation15_spill] sm:$0xff] %v3918_v11 }
 0x2e3   : > { %v3920_v13 = vpop.f32.mrf.mxu1 }
 0x2e4   : > { %4691 = vst [vmem:[#allocation16_spill] sm:$0xff] %v3920_v13 }
 0x2e5   : > { %v3922_v28 = vpop.f32.mrf.mxu1 }
 0x2e6   : > { %4692 = vst [vmem:[#allocation17_spill] sm:$0xff] %v3922_v28 }
 0x2e7   : > { %v3924_v34 = vpop.f32.mrf.mxu1 }
 0x2e8   : > { %4693 = vst [vmem:[#allocation18_spill] sm:$0xff] %v3924_v34 }
 0x2e9   : > { %v3926_v37 = vpop.f32.mrf.mxu1 }
 0x2ea   : > { %4694 = vst [vmem:[#allocation19_spill] sm:$0xff] %v3926_v37 }
 0x2eb   : > { %v3928_v41 = vpop.f32.mrf.mxu1 }
 0x2ec   : > { %4695 = vst [vmem:[#allocation20_spill] sm:$0xff] %v3928_v41 }
 0x2ed   : > { %v3930_v56 = vpop.f32.mrf.mxu1 }
 0x2ee   : > { %4696 = vst [vmem:[#allocation21_spill] sm:$0xff] %v3930_v56 }
 0x2ef   : > { %v3932_v42 = vpop.f32.mrf.mxu1 }
 0x2f0   : > { %4697 = vst [vmem:[#allocation22_spill] sm:$0xff] %v3932_v42 }
 0x2f1   : > { %v3934_v57 = vpop.f32.mrf.mxu1 }
 0x2f2   : > { %4698 = vst [vmem:[#allocation23_spill] sm:$0xff] %v3934_v57 }
 0x2f3   : > { %v3936_v31 = vpop.f32.mrf.mxu1 }
 0x2f4   : > { %4699 = vst [vmem:[#allocation24_spill] sm:$0xff] %v3936_v31 }
 0x2f5   : > { %v3938_v36 = vpop.f32.mrf.mxu1 }
 0x2f6   : > { %4700 = vst [vmem:[#allocation25_spill] sm:$0xff] %v3938_v36 }
 0x2f7   : > { %v3940_v49 = vpop.f32.mrf.mxu1 }
 0x2f8   : > { %4701 = vst [vmem:[#allocation26_spill] sm:$0xff] %v3940_v49 }
 0x2f9   : > { %v3942_v50 = vpop.f32.mrf.mxu1 }
 0x2fa   : > { %4702 = vst [vmem:[#allocation27_spill] sm:$0xff] %v3942_v50 }
 0x2fb   : > { %v3944_v53 = vpop.f32.mrf.mxu1 }
 0x2fc   : > { %v941_v0 = vsel %vm392_vm1, %v3944_v53, -inf }
 0x2fd   : > { %942 = vmax.xlane.f32.xlu1 %v941_v0  ;;  %v3948_v1 = vpop.f32.mrf.mxu1 }
 0x2fe   : > { %v938_v54 = vsel %vm392_vm1, %v3948_v1, -inf }
 0x2ff   : > { %939 = vmax.xlane.f32.xlu0 %v938_v54  ;;  %v3952_v39 = vpop.f32.mrf.mxu1 }
 0x300   : > { %v947_v44 = vsel %vm392_vm1, %v3952_v39, -inf }
 0x301   : > { %948 = vmax.xlane.f32.xlu1 %v947_v44  ;;  %v3956_v58 = vpop.f32.mrf.mxu1 }
 0x302   : > { %v944_v59 = vsel %vm392_vm1, %v3956_v58, -inf }
 0x303   : > { %945 = vmax.xlane.f32.xlu0 %v944_v59  ;;  %v3960_v52 = vpop.f32.mrf.mxu1 }
 0x304   : > { %v953_v60 = vsel %vm392_vm1, %v3960_v52, -inf }
 0x305   : > { %954 = vmax.xlane.f32.xlu1 %v953_v60  ;;  %v3964_v8 = vpop.f32.mrf.mxu1 }
 0x306   : > { %v950_v61 = vsel %vm392_vm1, %v3964_v8, -inf }
 0x307   : > { %951 = vmax.xlane.f32.xlu0 %v950_v61  ;;  %v3968_v62 = vpop.f32.mrf.mxu1 }
 0x308   : > { %v959_v63 = vsel %vm392_vm1, %v3968_v62, -inf }
 0x309   : > { %960 = vmax.xlane.f32.xlu1 %v959_v63  ;;  %v3972_v43 = vpop.f32.mrf.mxu1 }
 0x30a   : > { %v956_v48 = vsel %vm392_vm1, %v3972_v43, -inf }
 0x30b   : > { %957 = vmax.xlane.f32.xlu0 %v956_v48  ;;  %v3976_v2 = vpop.f32.mrf.mxu1 }
 0x30c   : > { %v965_v51 = vsel %vm392_vm1, %v3976_v2, -inf }
 0x30d   : > { %966 = vmax.xlane.f32.xlu1 %v965_v51  ;;  %v3980_v33 = vpop.f32.mrf.mxu1 }
 0x30e   : > { %v962_v3 = vsel %vm392_vm1, %v3980_v33, -inf }
 0x30f   : > { %963 = vmax.xlane.f32.xlu0 %v962_v3  ;;  %v3984_v4 = vpop.f32.mrf.mxu1 }
 0x310   : > { %v971_v6 = vsel %vm392_vm1, %v3984_v4, -inf }
 0x311   : > { %972 = vmax.xlane.f32.xlu1 %v971_v6  ;;  %v3988_v27 = vpop.f32.mrf.mxu1 }
 0x312   : > { %v968_v32 = vsel %vm392_vm1, %v3988_v27, -inf }
 0x313   : > { %969 = vmax.xlane.f32.xlu0 %v968_v32  ;;  %v3992_v45 = vpop.f32.mrf.mxu1 }
 0x314   : > { %v977_v40 = vsel %vm392_vm1, %v3992_v45, -inf }
 0x315   : > { %978 = vmax.xlane.f32.xlu1 %v977_v40  ;;  %v3996_v55 = vpop.f32.mrf.mxu1 }
 0x316   : > { %v974_v7 = vsel %vm392_vm1, %v3996_v55, -inf }
 0x317   : > { %975 = vmax.xlane.f32.xlu0 %v974_v7  ;;  %v4000_v47 = vpop.f32.mrf.mxu1 }
 0x318   : > { %v983_v26 = vsel %vm392_vm1, %v4000_v47, -inf }
 0x319   : > { %984 = vmax.xlane.f32.xlu1 %v983_v26  ;;  %v4004_v25 = vpop.f32.mrf.mxu1 }
 0x31a   : > { %v980_v29 = vsel %vm392_vm1, %v4004_v25, -inf }
 0x31b   : > { %v4008_v38 = vpop.f32.mrf.mxu1  ;;  %981 = vmax.xlane.f32.xlu0 %v980_v29 }
 0x31c   : > { %v1487_v46 = vsel %vm392_vm1, %v4008_v38, -inf }
 0x31d   : > { %1488 = vmax.xlane.f32.xlu1 %v1487_v46  ;;  %v4012_v30 = vpop.f32.mrf.mxu1 }
 0x31e   : > { %v1484_v35 = vsel %vm392_vm1, %v4012_v30, -inf }
 0x31f   : > { %v4016_v24 = vpop.f32.mrf.mxu1  ;;  %1485 = vmax.xlane.f32.xlu0 %v1484_v35 }
 0x320   : > { %v1493_v0 = vsel %vm392_vm1, %v4016_v24, -inf }
 0x321   : > { %1494 = vmax.xlane.f32.xlu1 %v1493_v0  ;;  %v4020_v54 = vpop.f32.mrf.mxu1 }
 0x322   : > { %v1490_v44 = vsel %vm392_vm1, %v4020_v54, -inf }
 0x323   : > { %v4024_v59 = vpop.f32.mrf.mxu1  ;;  %1491 = vmax.xlane.f32.xlu0 %v1490_v44 }
 0x324   : > { %v1499_v60 = vsel %vm392_vm1, %v4024_v59, -inf }
 0x325   : > { %1500 = vmax.xlane.f32.xlu1 %v1499_v60  ;;  %v4028_v61 = vpop.f32.mrf.mxu1 }
 0x326   : > { %v1496_v63 = vsel %vm392_vm1, %v4028_v61, -inf }
 0x327   : > { %v4032_v48 = vpop.f32.mrf.mxu1  ;;  %1497 = vmax.xlane.f32.xlu0 %v1496_v63 }
 0x328   : > { %v1505_v51 = vsel %vm392_vm1, %v4032_v48, -inf }
 0x329   : > { %1506 = vmax.xlane.f32.xlu1 %v1505_v51  ;;  %v4036_v3 = vpop.f32.mrf.mxu1 }
 0x32a   : > { %v1502_v6 = vsel %vm392_vm1, %v4036_v3, -inf }
 0x32b   : > { %v4040_v32 = vpop.f32.mrf.mxu1  ;;  %1503 = vmax.xlane.f32.xlu0 %v1502_v6 }
 0x32c   : > { %v1511_v40 = vsel %vm392_vm1, %v4040_v32, -inf }
 0x32d   : > { %1512 = vmax.xlane.f32.xlu1 %v1511_v40  ;;  %v4044_v7 = vpop.f32.mrf.mxu1 }
 0x32e   : > { %v1508_v26 = vsel %vm392_vm1, %v4044_v7, -inf }
 0x32f   : > { %v4048_v29 = vpop.f32.mrf.mxu1  ;;  %1509 = vmax.xlane.f32.xlu0 %v1508_v26 }
 0x330   : > { %v1517_v46 = vsel %vm392_vm1, %v4048_v29, -inf }
 0x331   : > { %1518 = vmax.xlane.f32.xlu1 %v1517_v46  ;;  %v4052_v35 = vpop.f32.mrf.mxu1 }
 0x332   : > { %v1514_v0 = vsel %vm392_vm1, %v4052_v35, -inf }
 0x333   : > { %v4056_v44 = vpop.f32.mrf.mxu1  ;;  %1515 = vmax.xlane.f32.xlu0 %v1514_v0 }
 0x334   : > { %v1523_v60 = vsel %vm392_vm1, %v4056_v44, -inf }
 0x335   : > { %1524 = vmax.xlane.f32.xlu1 %v1523_v60  ;;  %v4060_v63 = vpop.f32.mrf.mxu1 }
 0x336   : > { %v1520_v51 = vsel %vm392_vm1, %v4060_v63, -inf }
 0x337   : > { %v4064_v6 = vpop.f32.mrf.mxu1  ;;  %1521 = vmax.xlane.f32.xlu0 %v1520_v51 }
 0x338   : > { %v1529_v40 = vsel %vm392_vm1, %v4064_v6, -inf }
 0x339   : > { %1530 = vmax.xlane.f32.xlu1 %v1529_v40  ;;  %v4068_v26 = vpop.f32.mrf.mxu1 }
 0x33a   : > { %v1526_v46 = vsel %vm392_vm1, %v4068_v26, -inf }
 0x33b   : > { %v4072_v0 = vpop.f32.mrf.mxu1  ;;  %1527 = vmax.xlane.f32.xlu0 %v1526_v46 }
 0x33c   : > { %v2033_v60 = vsel %vm392_vm1, %v4072_v0, -inf }
 0x33d   : > { %2034 = vmax.xlane.f32.xlu1 %v2033_v60  ;;  %v4076_v50 = vpop.f32.mrf.mxu1 }
 0x33e   : > { %v2030_v51 = vsel %vm392_vm1, %v4076_v50, -inf }
 0x33f   : > { %v4080_v22 = vpop.f32.mrf.mxu1  ;;  %2031 = vmax.xlane.f32.xlu0 %v2030_v51 }
 0x340   : > { %v2039_v40 = vsel %vm392_vm1, %v4080_v22, -inf }
 0x341   : > { %2040 = vmax.xlane.f32.xlu1 %v2039_v40  ;;  %v4084_v49 = vpop.f32.mrf.mxu1 }
 0x342   : > { %v2036_v46 = vsel %vm392_vm1, %v4084_v49, -inf }
 0x343   : > { %v4088_v23 = vpop.f32.mrf.mxu1  ;;  %2037 = vmax.xlane.f32.xlu0 %v2036_v46 }
 0x344   : > { %v2045_v60 = vsel %vm392_vm1, %v4088_v23, -inf }
 0x345   : > { %2046 = vmax.xlane.f32.xlu1 %v2045_v60  ;;  %v4092_v36 = vpop.f32.mrf.mxu1 }
 0x346   : > { %v2042_v51 = vsel %vm392_vm1, %v4092_v36, -inf }
 0x347   : > { %v4096_v20 = vpop.f32.mrf.mxu1  ;;  %2043 = vmax.xlane.f32.xlu0 %v2042_v51 }
 0x348   : > { %v2051_v40 = vsel %vm392_vm1, %v4096_v20, -inf }
 0x349   : > { %2052 = vmax.xlane.f32.xlu1 %v2051_v40  ;;  %v4100_v31 = vpop.f32.mrf.mxu1 }
 0x34a   : > { %v2048_v46 = vsel %vm392_vm1, %v4100_v31, -inf }
 0x34b   : > { %v4104_v21 = vpop.f32.mrf.mxu1  ;;  %2049 = vmax.xlane.f32.xlu0 %v2048_v46 }
 0x34c   : > { %v2057_v60 = vsel %vm392_vm1, %v4104_v21, -inf }
 0x34d   : > { %2058 = vmax.xlane.f32.xlu1 %v2057_v60  ;;  %v4108_v57 = vpop.f32.mrf.mxu1 }
 0x34e   : > { %v2054_v51 = vsel %vm392_vm1, %v4108_v57, -inf }
 0x34f   : > { %v4112_v18 = vpop.f32.mrf.mxu1  ;;  %2055 = vmax.xlane.f32.xlu0 %v2054_v51 }
 0x350   : > { %v2063_v40 = vsel %vm392_vm1, %v4112_v18, -inf }
 0x351   : > { %2064 = vmax.xlane.f32.xlu1 %v2063_v40  ;;  %v4116_v42 = vpop.f32.mrf.mxu1 }
 0x352   : > { %v2060_v46 = vsel %vm392_vm1, %v4116_v42, -inf }
 0x353   : > { %v4120_v19 = vpop.f32.mrf.mxu1  ;;  %2061 = vmax.xlane.f32.xlu0 %v2060_v46 }
 0x354   : > { %v2069_v60 = vsel %vm392_vm1, %v4120_v19, -inf }
 0x355   : > { %v4124_v56 = vpop.f32.mrf.mxu1 }
 0x356   : > { %v2066_v51 = vsel %vm392_vm1, %v4124_v56, -inf }
 0x357   : > { %2070 = vmax.xlane.f32.xlu0 %v2069_v60  ;;  %v4126_v16 = vpop.f32.mrf.mxu1  ;;  %v2564_v60 = vld [vmem:[%s4664_s2 + $0x58] sm:$0xff] }
 0x358   : > { %v2075_v46 = vsel %vm392_vm1, %v4126_v16, -inf  ;;  %2975 = vmatprep.subr.mxu0 %v2564_v60 }
 0x359   : > { %v4130_v40 = vpop.f32.mrf.mxu1  ;;  %2976 = vmatpush3.msra.mxu0 %v2564_v60 }
 0x35a   : > { %v2072_v41 = vsel %vm392_vm1, %v4130_v40, -inf  ;;  %2977 = vmatprep.subr.mxu0 %v2563_v17 }
 0x35b   : > { %2067 = vmax.xlane.f32.xlu0 %v2066_v51  ;;  %2978 = vmatpush3.msra.mxu0 %v2563_v17 }
 0x35f   : > { %2073 = vmax.xlane.f32.xlu0 %v2072_v41 }
 0x363   : > { %2076 = vmax.xlane.f32.xlu0 %v2075_v46 }
 0x386   : > { %v943_v51 = vpop.xlane.xlu1 %942 }
 0x387   : > { %v987_v37 = vsub.f32 %v3944_v53, %v943_v51 }
 0x388   : > { %v940_v41 = vpop.xlane.xlu0 %939 }
 0x389   : > { %v1004_v14 = vmul.f32 1.442695, %v987_v37  ;;  %v986_v34 = vsub.f32 %v3948_v1, %v940_v41 }
 0x38a   : > { %v949_v46 = vpop.xlane.xlu1 %948 }
 0x38b   : > { %3235 = vpow2.f32 %v1004_v14  ;;  %v1002_v15 = vmul.f32 1.442695, %v986_v34  ;;  %v989_v28 = vsub.f32 %v3952_v39, %v949_v46 }
 0x38c   : > { %v946_v12 = vpop.xlane.xlu0 %945 }
 0x38d   : > { %3237 = vpow2.f32 %v1002_v15  ;;  %v988_v13 = vsub.f32 %v3956_v58, %v946_v12  ;;  %v1008_v10 = vmul.f32 1.442695, %v989_v28 }
 0x38e   : > { %v955_v11 = vpop.xlane.xlu1 %954 }
 0x38f   : > { %v1006_v60 = vmul.f32 1.442695, %v988_v13  ;;  %v991_v17 = vsub.f32 %v3960_v52, %v955_v11 }
 0x390   : > { %v952_v9 = vpop.xlane.xlu0 %951 }
 0x391   : > { %3239 = vpow2.f32 %v1006_v60  ;;  %v990_v37 = vsub.f32 %v3964_v8, %v952_v9  ;;  %v1012_v14 = vmul.f32 1.442695, %v991_v17 }
 0x392   : > { %v961_v53 = vpop.xlane.xlu1 %960  ;;  %3241 = vpow2.f32 %v1008_v10 }
 0x393   : > { %v1010_v1 = vmul.f32 1.442695, %v990_v37  ;;  %v993_v34 = vsub.f32 %v3968_v62, %v961_v53 }
 0x394   : > { %v958_v39 = vpop.xlane.xlu0 %957 }
 0x395   : > { %3243 = vpow2.f32 %v1010_v1  ;;  %v992_v15 = vsub.f32 %v3972_v43, %v958_v39  ;;  %v1016_v11 = vmul.f32 1.442695, %v993_v34 }
 0x396   : > { %v967_v12 = vpop.xlane.xlu1 %966  ;;  %3245 = vpow2.f32 %v1012_v14 }
 0x397   : > { %v1014_v58 = vmul.f32 1.442695, %v992_v15  ;;  %v995_v28 = vsub.f32 %v3976_v2, %v967_v12 }
 0x398   : > { %v4150_v13 = vpop.eup %3235  ;;  %v964_v52 = vpop.xlane.xlu0 %963 }
 0x399   : > { %3247 = vpow2.f32 %v1014_v58  ;;  %v994_v9 = vsub.f32 %v3980_v33, %v964_v52  ;;  %v1037_v10 = vsel %vm392_vm1, %v4150_v13, 0.0  ;;  %v1020_v51 = vmul.f32 1.442695, %v995_v28 }
 0x39a   : > { %v4156_v8 = vpop.eup %3237  ;;  %v973_v62 = vpop.xlane.xlu1 %972  ;;  %1038 = vadd.xlane.f32.xlu1 %v1037_v10  ;;  %3249 = vpow2.f32 %v1016_v11 }
 0x39b   : > { %v1018_v43 = vmul.f32 1.442695, %v994_v9  ;;  %v997_v41 = vsub.f32 %v3984_v4, %v973_v62  ;;  %v1034_v60 = vsel %vm392_vm1, %v4156_v8, 0.0 }
 0x39c   : > { %v970_v46 = vpop.xlane.xlu0 %969 }
 0x39d   : > { %3251 = vpow2.f32 %v1018_v43  ;;  %v996_v2 = vsub.f32 %v3988_v27, %v970_v46  ;;  %v1024_v53 = vmul.f32 1.442695, %v997_v41 }
 0x39e   : > { %v4162_v33 = vpop.eup %3239  ;;  %v979_v17 = vpop.xlane.xlu1 %978  ;;  %1035 = vadd.xlane.f32.xlu1 %v1034_v60  ;;  %3253 = vpow2.f32 %v1020_v51 }
 0x39f   : > { %v1022_v37 = vmul.f32 1.442695, %v996_v2  ;;  %v999_v1 = vsub.f32 %v3992_v45, %v979_v17  ;;  %v4165_v34 = vpop.eup %3241  ;;  %v1040_v27 = vsel %vm392_vm1, %v4162_v33, 0.0 }
 0x3a0   : > { %v976_v14 = vpop.xlane.xlu0 %975  ;;  %v1043_v9 = vsel %vm392_vm1, %v4165_v34, 0.0 }
 0x3a1   : > { %3255 = vpow2.f32 %v1022_v37  ;;  %v998_v4 = vsub.f32 %v3996_v55, %v976_v14  ;;  %v1028_v11 = vmul.f32 1.442695, %v999_v1 }
 0x3a2   : > { %v4170_v39 = vpop.eup %3243  ;;  %v985_v15 = vpop.xlane.xlu1 %984  ;;  %1041 = vadd.xlane.f32.xlu1 %v1040_v27  ;;  %3257 = vpow2.f32 %v1024_v53 }
 0x3a3   : > { %v1026_v12 = vmul.f32 1.442695, %v998_v4  ;;  %v1046_v58 = vsel %vm392_vm1, %v4170_v39, 0.0  ;;  %v1001_v45 = vsub.f32 %v4000_v47, %v985_v15  ;;  %v4175_v52 = vpop.eup %3245 }
 0x3a4   : > { %1047 = vadd.xlane.f32.xlu0 %v1046_v58  ;;  %v982_v28 = vpop.xlane.xlu0 %981  ;;  %v1049_v60 = vsel %vm392_vm1, %v4175_v52, 0.0 }
 0x3a5   : > { %3259 = vpow2.f32 %v1026_v12  ;;  %v1000_v55 = vsub.f32 %v4004_v25, %v982_v28  ;;  %v1032_v47 = vmul.f32 1.442695, %v1001_v45 }
 0x3a6   : > { %v4180_v10 = vpop.eup %3247  ;;  %v1489_v62 = vpop.xlane.xlu1 %1488  ;;  %1044 = vadd.xlane.f32.xlu1 %v1043_v9  ;;  %3261 = vpow2.f32 %v1028_v11 }
 0x3a7   : > { %v1030_v43 = vmul.f32 1.442695, %v1000_v55  ;;  %v1052_v51 = vsel %vm392_vm1, %v4180_v10, 0.0  ;;  %v1533_v41 = vsub.f32 %v4008_v38, %v1489_v62  ;;  %v4185_v2 = vpop.eup %3249 }
 0x3a8   : > { %1053 = vadd.xlane.f32.xlu0 %v1052_v51  ;;  %v1486_v46 = vpop.xlane.xlu0 %1485  ;;  %v1055_v15 = vsel %vm392_vm1, %v4185_v2, 0.0 }
 0x3a9   : > { %3263 = vpow2.f32 %v1030_v43  ;;  %v1532_v25 = vsub.f32 %v4012_v30, %v1486_v46  ;;  %v1550_v38 = vmul.f32 1.442695, %v1533_v41  ;;  %v2562_v43 = vld [vmem:[%s4664_s2 + $0x48] sm:$0xff]  ;;  %v2560_v46 = vld [vmem:[%s4664_s2 + $0x38] sm:$0xff] }
 0x3aa   : > { %v4190_v17 = vpop.eup %3251  ;;  %v1495_v37 = vpop.xlane.xlu1 %1494  ;;  %1050 = vadd.xlane.f32.xlu1 %v1049_v60  ;;  %3265 = vpow2.f32 %v1032_v47  ;;  %2979 = vmatprep.subr.mxu0 %v2562_v43 }
 0x3ab   : > { %v1548_v53 = vmul.f32 1.442695, %v1532_v25  ;;  %v1058_v1 = vsel %vm392_vm1, %v4190_v17, 0.0  ;;  %v1535_v14 = vsub.f32 %v4016_v24, %v1495_v37  ;;  %v4195_v27 = vpop.eup %3253  ;;  %2980 = vmatpush3.msra.mxu0 %v2562_v43 }
 0x3ac   : > { %1059 = vadd.xlane.f32.xlu0 %v1058_v1  ;;  %v1492_v4 = vpop.xlane.xlu0 %1491  ;;  %v1061_v62 = vsel %vm392_vm1, %v4195_v27, 0.0 }
 0x3ad   : > { %3267 = vpow2.f32 %v1548_v53  ;;  %v1534_v30 = vsub.f32 %v4020_v54, %v1492_v4  ;;  %v1554_v24 = vmul.f32 1.442695, %v1535_v14 }
 0x3ae   : > { %v4200_v12 = vpop.eup %3255  ;;  %v1501_v58 = vpop.xlane.xlu1 %1500  ;;  %1056 = vadd.xlane.f32.xlu1 %v1055_v15  ;;  %3269 = vpow2.f32 %v1550_v38 }
 0x3af   : > { %v1552_v11 = vmul.f32 1.442695, %v1534_v30  ;;  %v1064_v45 = vsel %vm392_vm1, %v4200_v12, 0.0  ;;  %v1537_v28 = vsub.f32 %v4024_v59, %v1501_v58  ;;  %v4205_v9 = vpop.eup %3257  ;;  %v2561_v59 = vld [vmem:[%s4664_s2 + $0x40] sm:$0xff] }
 0x3b0   : > { %1065 = vadd.xlane.f32.xlu0 %v1064_v45  ;;  %v1498_v55 = vpop.xlane.xlu0 %1497  ;;  %2981 = vmatprep.subr.mxu0 %v2561_v59  ;;  %v1067_v38 = vsel %vm392_vm1, %v4205_v9, 0.0 }
 0x3b1   : > { %3271 = vpow2.f32 %v1552_v11  ;;  %v1536_v54 = vsub.f32 %v4028_v61, %v1498_v55  ;;  %v1558_v25 = vmul.f32 1.442695, %v1537_v28  ;;  %2982 = vmatpush3.msra.mxu0 %v2561_v59 }
 0x3b2   : > { %v4213_v51 = vpop.eup %3259  ;;  %v1507_v47 = vpop.xlane.xlu1 %1506  ;;  %1062 = vadd.xlane.f32.xlu1 %v1061_v62  ;;  %3273 = vpow2.f32 %v1554_v24  ;;  %2983 = vmatprep.subr.mxu0 %v2560_v46 }
 0x3b3   : > { %v1556_v41 = vmul.f32 1.442695, %v1536_v54  ;;  %v1070_v61 = vsel %vm392_vm1, %v4213_v51, 0.0  ;;  %v1539_v60 = vsub.f32 %v4032_v48, %v1507_v47  ;;  %v4224_v53 = vpop.eup %3261  ;;  %v2559_v48 = vld [vmem:[%s4664_s2 + $0x30] sm:$0xff]  ;;  %2984 = vmatpush3.msra.mxu0 %v2560_v46 }
 0x3b4   : > { %1071 = vadd.xlane.f32.xlu0 %v1070_v61  ;;  %v1504_v37 = vpop.xlane.xlu0 %1503  ;;  %2985 = vmatprep.subr.mxu0 %v2559_v48  ;;  %v1073_v28 = vsel %vm392_vm1, %v4224_v53, 0.0 }
 0x3b5   : > { %3275 = vpow2.f32 %v1556_v41  ;;  %v1538_v1 = vsub.f32 %v4036_v3, %v1504_v37  ;;  %v1562_v3 = vmul.f32 1.442695, %v1539_v60  ;;  %2986 = vmatpush3.msra.mxu0 %v2559_v48 }
 0x3b6   : > { %v4229_v14 = vpop.eup %3263  ;;  %v1513_v4 = vpop.xlane.xlu1 %1512  ;;  %1068 = vadd.xlane.f32.xlu1 %v1067_v38  ;;  %3277 = vpow2.f32 %v1558_v25 }
 0x3b7   : > { %v1560_v30 = vmul.f32 1.442695, %v1538_v1  ;;  %v1076_v15 = vsel %vm392_vm1, %v4229_v14, 0.0  ;;  %v1541_v58 = vsub.f32 %v4040_v32, %v1513_v4  ;;  %v4237_v45 = vpop.eup %3265 }
 0x3b8   : > { %1077 = vadd.xlane.f32.xlu0 %v1076_v15  ;;  %v1510_v11 = vpop.xlane.xlu0 %1509  ;;  %v1079_v46 = vsel %vm392_vm1, %v4237_v45, 0.0 }
 0x3b9   : > { %3279 = vpow2.f32 %v1560_v30  ;;  %v1540_v24 = vsub.f32 %v4044_v7, %v1510_v11  ;;  %v1566_v43 = vmul.f32 1.442695, %v1541_v58  ;;  %v4250_v7 = vld [vmem:[%s4664_s2 + $0x88] sm:$0xff] }
 0x3ba   : > { %v4242_v55 = vpop.eup %3267  ;;  %v1519_v54 = vpop.xlane.xlu1 %1518  ;;  %1074 = vadd.xlane.f32.xlu1 %v1073_v28  ;;  %3281 = vpow2.f32 %v1562_v3  ;;  %3051 = vmatprep.subr.mxu0 %v4250_v7 }
 0x3bb   : > { %v1564_v62 = vmul.f32 1.442695, %v1540_v24  ;;  %v1580_v32 = vsel %vm392_vm1, %v4242_v55, 0.0  ;;  %v1543_v47 = vsub.f32 %v4048_v29, %v1519_v54  ;;  %v4252_v41 = vpop.eup %3269 }
 0x3bc   : > { %1581 = vadd.xlane.f32.xlu0 %v1580_v32  ;;  %v1516_v59 = vpop.xlane.xlu0 %1515  ;;  %v1583_v30 = vsel %vm392_vm1, %v4252_v41, 0.0 }
 0x3bd   : > { %3283 = vpow2.f32 %v1564_v62  ;;  %v1542_v61 = vsub.f32 %v4052_v35, %v1516_v59  ;;  %v1570_v1 = vmul.f32 1.442695, %v1543_v47 }
 0x3be   : > { %v4258_v25 = vpop.eup %3271  ;;  %v1525_v29 = vpop.xlane.xlu1 %1524  ;;  %1080 = vadd.xlane.f32.xlu1 %v1079_v46  ;;  %3285 = vpow2.f32 %v1566_v43 }
 0x3bf   : > { %v1568_v60 = vmul.f32 1.442695, %v1542_v61  ;;  %v1586_v37 = vsel %vm392_vm1, %v4258_v25, 0.0  ;;  %v1545_v38 = vsub.f32 %v4056_v44, %v1525_v29  ;;  %v4263_v35 = vpop.eup %3273 }
 0x3c0   : > { %1587 = vadd.xlane.f32.xlu0 %v1586_v37  ;;  %v1522_v4 = vpop.xlane.xlu0 %1521  ;;  %v1589_v62 = vsel %vm392_vm1, %v4263_v35, 0.0 }
 0x3c1   : > { %3287 = vpow2.f32 %v1568_v60  ;;  %v1544_v48 = vsub.f32 %v4060_v63, %v1522_v4  ;;  %v1574_v44 = vmul.f32 1.442695, %v1545_v38 }
 0x3c2   : > { %v4268_v15 = vpop.eup %3275  ;;  %v1531_v3 = vpop.xlane.xlu1 %1530  ;;  %1584 = vadd.xlane.f32.xlu1 %v1583_v30  ;;  %3289 = vpow2.f32 %v1570_v1 }
 0x3c3   : > { %v1572_v58 = vmul.f32 1.442695, %v1544_v48  ;;  %v1592_v11 = vsel %vm392_vm1, %v4268_v15, 0.0  ;;  %v1547_v24 = vsub.f32 %v4064_v6, %v1531_v3  ;;  %v4273_v54 = vpop.eup %3277 }
 0x3c4   : > { %1593 = vadd.xlane.f32.xlu0 %v1592_v11  ;;  %v1528_v28 = vpop.xlane.xlu0 %1527  ;;  %v1595_v60 = vsel %vm392_vm1, %v4273_v54, 0.0 }
 0x3c5   : > { %3291 = vpow2.f32 %v1572_v58  ;;  %v1546_v63 = vsub.f32 %v4068_v26, %v1528_v28  ;;  %v1578_v6 = vmul.f32 1.442695, %v1547_v24 }
 0x3c6   : > { %v4278_v32 = vpop.eup %3279  ;;  %v2035_v43 = vpop.xlane.xlu1 %2034  ;;  %1590 = vadd.xlane.f32.xlu1 %v1589_v62  ;;  %3293 = vpow2.f32 %v1574_v44 }
 0x3c7   : > { %v1576_v47 = vmul.f32 1.442695, %v1546_v63  ;;  %v1598_v59 = vsel %vm392_vm1, %v4278_v32, 0.0  ;;  %v2079_v61 = vsub.f32 %v4072_v0, %v2035_v43  ;;  %v4283_v29 = vpop.eup %3281 }
 0x3c8   : > { %1599 = vadd.xlane.f32.xlu0 %v1598_v59  ;;  %v2032_v46 = vpop.xlane.xlu0 %2031  ;;  %v1601_v58 = vsel %vm392_vm1, %v4283_v29, 0.0 }
 0x3c9   : > { %3295 = vpow2.f32 %v1576_v47  ;;  %v2078_v26 = vsub.f32 %v4076_v50, %v2032_v46  ;;  %v2096_v0 = vmul.f32 1.442695, %v2079_v61 }
 0x3ca   : > { %v4288_v37 = vpop.eup %3283  ;;  %v2041_v1 = vpop.xlane.xlu1 %2040  ;;  %1596 = vadd.xlane.f32.xlu1 %v1595_v60  ;;  %3297 = vpow2.f32 %v1578_v6 }
 0x3cb   : > { %v2094_v38 = vmul.f32 1.442695, %v2078_v26  ;;  %v1604_v4 = vsel %vm392_vm1, %v4288_v37, 0.0  ;;  %v2081_v48 = vsub.f32 %v4080_v22, %v2041_v1  ;;  %v4293_v3 = vpop.eup %3285 }
 0x3cc   : > { %1605 = vadd.xlane.f32.xlu0 %v1604_v4  ;;  %v2038_v30 = vpop.xlane.xlu0 %2037  ;;  %v1607_v47 = vsel %vm392_vm1, %v4293_v3, 0.0 }
 0x3cd   : > { %3299 = vpow2.f32 %v2094_v38  ;;  %v2080_v50 = vsub.f32 %v4084_v49, %v2038_v30  ;;  %v2100_v22 = vmul.f32 1.442695, %v2081_v48 }
 0x3ce   : > { %v4298_v11 = vpop.eup %3287  ;;  %v2047_v44 = vpop.xlane.xlu1 %2046  ;;  %1602 = vadd.xlane.f32.xlu1 %v1601_v58  ;;  %3301 = vpow2.f32 %v2096_v0 }
 0x3cf   : > { %v2098_v24 = vmul.f32 1.442695, %v2080_v50  ;;  %v1610_v28 = vsel %vm392_vm1, %v4298_v11, 0.0  ;;  %v2083_v63 = vsub.f32 %v4088_v23, %v2047_v44  ;;  %v4303_v43 = vpop.eup %3289 }
 0x3d0   : > { %1611 = vadd.xlane.f32.xlu0 %v1610_v28  ;;  %v2044_v62 = vpop.xlane.xlu0 %2043  ;;  %v1613_v38 = vsel %vm392_vm1, %v4303_v43, 0.0 }
 0x3d1   : > { %3303 = vpow2.f32 %v2098_v24  ;;  %v2082_v49 = vsub.f32 %v4092_v36, %v2044_v62  ;;  %v2104_v23 = vmul.f32 1.442695, %v2083_v63 }
 0x3d2   : > { %v4308_v59 = vpop.eup %3291  ;;  %v2053_v6 = vpop.xlane.xlu1 %2052  ;;  %1608 = vadd.xlane.f32.xlu1 %v1607_v47  ;;  %3305 = vpow2.f32 %v2100_v22 }
 0x3d3   : > { %v2102_v61 = vmul.f32 1.442695, %v2082_v49  ;;  %v1616_v46 = vsel %vm392_vm1, %v4308_v59, 0.0  ;;  %v2085_v26 = vsub.f32 %v4096_v20, %v2053_v6  ;;  %v4313_v1 = vpop.eup %3293 }
 0x3d4   : > { %1617 = vadd.xlane.f32.xlu0 %v1616_v46  ;;  %v2050_v60 = vpop.xlane.xlu0 %2049  ;;  %v1619_v24 = vsel %vm392_vm1, %v4313_v1, 0.0 }
 0x3d5   : > { %3307 = vpow2.f32 %v2102_v61  ;;  %v2084_v36 = vsub.f32 %v4100_v31, %v2050_v60  ;;  %v2108_v20 = vmul.f32 1.442695, %v2085_v26 }
 0x3d6   : > { %v4318_v4 = vpop.eup %3295  ;;  %v2059_v0 = vpop.xlane.xlu1 %2058  ;;  %1614 = vadd.xlane.f32.xlu1 %v1613_v38  ;;  %3309 = vpow2.f32 %v2104_v23 }
 0x3d7   : > { %v2106_v48 = vmul.f32 1.442695, %v2084_v36  ;;  %v1622_v30 = vsel %vm392_vm1, %v4318_v4, 0.0  ;;  %v2087_v50 = vsub.f32 %v4104_v21, %v2059_v0  ;;  %v4323_v44 = vpop.eup %3297 }
 0x3d8   : > { %1623 = vadd.xlane.f32.xlu0 %v1622_v30  ;;  %v2056_v58 = vpop.xlane.xlu0 %2055  ;;  %v1625_v61 = vsel %vm392_vm1, %v4323_v44, 0.0 }
 0x3d9   : > { %3311 = vpow2.f32 %v2106_v48  ;;  %v2086_v31 = vsub.f32 %v4108_v57, %v2056_v58  ;;  %v2112_v21 = vmul.f32 1.442695, %v2087_v50 }
 0x3da   : > { %v4328_v28 = vpop.eup %3299  ;;  %1620 = vadd.xlane.f32.xlu1 %v1619_v24  ;;  %v2065_v22 = vpop.xlane.xlu1 %2064  ;;  %3313 = vpow2.f32 %v2108_v20 }
 0x3db   : > { %v2110_v63 = vmul.f32 1.442695, %v2086_v31  ;;  %v2126_v62 = vsel %vm392_vm1, %v4328_v28, 0.0  ;;  %v4332_v47 = vpop.eup %3301  ;;  %v2089_v57 = vsub.f32 %v4112_v18, %v2065_v22 }
 0x3dc   : > { %2127 = vadd.xlane.f32.xlu0 %v2126_v62  ;;  %v2062_v49 = vpop.xlane.xlu0 %2061 }
 0x3dd   : > { %3315 = vpow2.f32 %v2110_v63  ;;  %v2088_v6 = vsub.f32 %v4116_v42, %v2062_v49  ;;  %v2116_v38 = vmul.f32 1.442695, %v2089_v57  ;;  %v2129_v42 = vsel %vm392_vm1, %v4332_v47, 0.0 }
 0x3de   : > { %v4338_v46 = vpop.eup %3303  ;;  %1626 = vadd.xlane.f32.xlu1 %v1625_v61  ;;  %3317 = vpow2.f32 %v2112_v21 }
 0x3df   : > { %v2114_v23 = vmul.f32 1.442695, %v2088_v6  ;;  %v2132_v26 = vsel %vm392_vm1, %v4338_v46, 0.0  ;;  %v4342_v36 = vpop.eup %3305 }
 0x3e0   : > { %2133 = vadd.xlane.f32.xlu0 %v2132_v26  ;;  %v2071_v60 = vpop.xlane.xlu0 %2070 }
 0x3e1   : > { %3319 = vpow2.f32 %v2114_v23  ;;  %v2091_v18 = vsub.f32 %v4120_v19, %v2071_v60  ;;  %v2135_v19 = vsel %vm392_vm1, %v4342_v36, 0.0 }
 0x3e2   : > { %v4347_v0 = vpop.eup %3307  ;;  %2130 = vadd.xlane.f32.xlu1 %v2129_v42  ;;  %3321 = vpow2.f32 %v2116_v38 }
 0x3e3   : > { %v2138_v48 = vsel %vm392_vm1, %v4347_v0, 0.0  ;;  %v2120_v30 = vmul.f32 1.442695, %v2091_v18  ;;  %v4351_v50 = vpop.eup %3309 }
 0x3e4   : > { %2139 = vadd.xlane.f32.xlu0 %v2138_v48  ;;  %v2068_v20 = vpop.xlane.xlu0 %2067 }
 0x3e5   : > { %v2090_v58 = vsub.f32 %v4124_v56, %v2068_v20  ;;  %3323 = vpow2.f32 %v2120_v30  ;;  %v2141_v56 = vsel %vm392_vm1, %v4351_v50, 0.0 }
 0x3e6   : > { %v4356_v31 = vpop.eup %3311  ;;  %2136 = vadd.xlane.f32.xlu1 %v2135_v19 }
 0x3e7   : > { %v2118_v24 = vmul.f32 1.442695, %v2090_v58  ;;  %v2144_v22 = vsel %vm392_vm1, %v4356_v31, 0.0  ;;  %v4360_v62 = vpop.eup %3313 }
 0x3e8   : > { %2145 = vadd.xlane.f32.xlu0 %v2144_v22  ;;  %v2074_v63 = vpop.xlane.xlu0 %2073 }
 0x3e9   : > { %3325 = vpow2.f32 %v2118_v24  ;;  %v2092_v21 = vsub.f32 %v4130_v40, %v2074_v63  ;;  %v2147_v40 = vsel %vm392_vm1, %v4360_v62, 0.0 }
 0x3ea   : > { %v4365_v49 = vpop.eup %3315  ;;  %2142 = vadd.xlane.f32.xlu1 %v2141_v56 }
 0x3eb   : > { %v2122_v57 = vmul.f32 1.442695, %v2092_v21  ;;  %v2150_v6 = vsel %vm392_vm1, %v4365_v49, 0.0  ;;  %v4369_v23 = vpop.eup %3317 }
 0x3ec   : > { %2151 = vadd.xlane.f32.xlu0 %v2150_v6  ;;  %v2077_v61 = vpop.xlane.xlu0 %2076  ;;  %v2153_v42 = vsel %vm392_vm1, %v4369_v23, 0.0 }
 0x3ed   : > { %3327 = vpow2.f32 %v2122_v57  ;;  %v2093_v26 = vsub.f32 %v4126_v16, %v2077_v61 }
 0x3ee   : > { %v4374_v60 = vpop.eup %3319  ;;  %2148 = vadd.xlane.f32.xlu1 %v2147_v40 }
 0x3ef   : > { %v2124_v38 = vmul.f32 1.442695, %v2093_v26  ;;  %v2156_v18 = vsel %vm392_vm1, %v4374_v60, 0.0  ;;  %v4380_v48 = vpop.eup %3321 }
 0x3f0   : > { %2157 = vadd.xlane.f32.xlu0 %v2156_v18  ;;  %v2159_v16 = vsel %vm392_vm1, %v4380_v48, 0.0 }
 0x3f1   : > { %3329 = vpow2.f32 %v2124_v38 }
 0x3f2   : > { %2154 = vadd.xlane.f32.xlu1 %v2153_v42  ;;  %v4382_v30 = vpop.eup %3323 }
 0x3f3   : > { %v2165_v19 = vsel %vm392_vm1, %v4382_v30, 0.0 }
 0x3f6   : > { %v4386_v20 = vpop.eup %3325  ;;  %2160 = vadd.xlane.f32.xlu1 %v2159_v16 }
 0x3f7   : > { %v2162_v58 = vsel %vm392_vm1, %v4386_v20, 0.0 }
 0x3f8   : > { %2163 = vadd.xlane.f32.xlu0 %v2162_v58 }
 0x3fa   : > { %v4392_v24 = vpop.eup %3327  ;;  %2166 = vadd.xlane.f32.xlu1 %v2165_v19 }
 0x3fb   : > { %v2168_v22 = vsel %vm392_vm1, %v4392_v24, 0.0 }
 0x3fc   : > { %2169 = vadd.xlane.f32.xlu0 %v2168_v22 }
 0x3fe   : > { %v4396_v63 = vpop.eup %3329 }
 0x3ff   : > { %v2171_v21 = vsel %vm392_vm1, %v4396_v63, 0.0 }
 0x400   : > { %2172 = vadd.xlane.f32.xlu1 %v2171_v21  ;;  %v2609_v21 = vld [vmem:[%s4664_s2 + $0x80] sm:$0xff] }
 0x423   : > { %v1039_v56 = vpop.xlane.xlu1 %1038 }
 0x424   : > { %3331 = vrcp.f32 %v1039_v56 }
 0x427   : > { %v1036_v57 = vpop.xlane.xlu1 %1035 }
 0x428   : > { %3333 = vrcp.f32 %v1036_v57 }
 0x42b   : > { %v1042_v6 = vpop.xlane.xlu1 %1041 }
 0x42c   : > { %3335 = vrcp.f32 %v1042_v6 }
 0x42d   : > { %v1048_v61 = vpop.xlane.xlu0 %1047 }
 0x42e   : > { %3337 = vrcp.f32 %v1048_v61 }
 0x42f   : > { %v1045_v26 = vpop.xlane.xlu1 %1044 }
 0x430   : > { %3339 = vrcp.f32 %v1045_v26  ;;  %v2607_v26 = vld [vmem:[%s4664_s2 + $0x70] sm:$0xff] }
 0x431   : > { %v1054_v40 = vpop.xlane.xlu0 %1053  ;;  %v3332_v18 = vpop.eup %3331 }
 0x432   : > { %3341 = vrcp.f32 %v1054_v40  ;;  %v1085_v19 = vmul.f32 %v3332_v18, %v4150_v13  ;;  %v2608_v13 = vld [vmem:[%s4664_s2 + $0x78] sm:$0xff] }
 0x433   : > { %v1051_v38 = vpop.xlane.xlu1 %1050 }
 0x434   : > { %3343 = vrcp.f32 %v1051_v38 }
 0x435   : > { %v3334_v42 = vpop.eup %3333  ;;  %v1060_v16 = vpop.xlane.xlu0 %1059 }
 0x436   : > { %v1083_v58 = vmul.f32 %v3334_v42, %v4156_v8  ;;  %3345 = vrcp.f32 %v1060_v16  ;;  %v2606_v42 = vld [vmem:[%s4664_s2 + $0x68] sm:$0xff] }
 0x437   : > { %v1057_v22 = vpop.xlane.xlu1 %1056 }
 0x438   : > { %3347 = vrcp.f32 %v1057_v22  ;;  %2987 = vmatprep.mubr.msk.f32.mxu0 %vm392_vm1, %v1083_v58 }
 0x439   : > { %v3336_v56 = vpop.eup %3335  ;;  %2988 = vmatmul.mubr.msk.f32.vlgmr.msra.gmra.mxu0 %vm392_vm1, %v1085_v19  ;;  %v1066_v57 = vpop.xlane.xlu0 %1065 }
 0x43a   : > { %v1087_v6 = vmul.f32 %v3336_v56, %v4162_v33  ;;  %3052 = vmatpush3.msra.mxu0 %v4250_v7  ;;  %3349 = vrcp.f32 %v1066_v57  ;;  %v4431_v56 = vld [vmem:[%s4664_s2 + $0xb8] sm:$0xff] }
 0x43b   : > { %v1063_v8 = vpop.xlane.xlu1 %1062  ;;  %3053 = vmatprep.subr.mxu0 %v2609_v21  ;;  %v3338_v61 = vpop.eup %3337 }
 0x43c   : > { %3351 = vrcp.f32 %v1063_v8  ;;  %2990 = vmatprep.mubr.msk.f32.mxu0 %vm392_vm1, %v1087_v6  ;;  %3054 = vmatpush3.msra.mxu0 %v2609_v21  ;;  %v1091_v18 = vmul.f32 %v3338_v61, %v4170_v39 }
 0x43d   : > { %v3340_v40 = vpop.eup %3339  ;;  %v1072_v33 = vpop.xlane.xlu0 %1071  ;;  %3055 = vmatprep.subr.mxu0 %v2608_v13 }
 0x43e   : > { %v1089_v7 = vmul.f32 %v3340_v40, %v4165_v34  ;;  %3056 = vmatpush3.msra.mxu0 %v2608_v13  ;;  %3353 = vrcp.f32 %v1072_v33  ;;  %v2605_v34 = vld [vmem:[%s4664_s2 + $0x60] sm:$0xff] }
 0x43f   : > { %v1069_v38 = vpop.xlane.xlu1 %1068  ;;  %3057 = vmatprep.subr.mxu0 %v2607_v26  ;;  %v3342_v16 = vpop.eup %3341 }
 0x440   : > { %3355 = vrcp.f32 %v1069_v38  ;;  %2991 = vmatmul.mubr.msk.f32.gmra.mxu0 %vm392_vm1, %v1089_v7  ;;  %v1095_v21 = vmul.f32 %v3342_v16, %v4180_v10 }
 0x441   : > { %v3344_v58 = vpop.eup %3343  ;;  %2993 = vmatprep.mubr.msk.f32.mxu0 %vm392_vm1, %v1091_v18  ;;  %v1078_v19 = vpop.xlane.xlu0 %1077  ;;  %3058 = vmatpush3.msra.mxu0 %v2607_v26 }
 0x442   : > { %v1093_v39 = vmul.f32 %v3344_v58, %v4175_v52  ;;  %3059 = vmatprep.subr.mxu0 %v2606_v42  ;;  %3357 = vrcp.f32 %v1078_v19 }
 0x443   : > { %v1075_v22 = vpop.xlane.xlu1 %1074  ;;  %3060 = vmatpush3.msra.mxu0 %v2606_v42  ;;  %v3346_v57 = vpop.eup %3345 }
 0x444   : > { %3359 = vrcp.f32 %v1075_v22  ;;  %2994 = vmatmul.mubr.msk.f32.gmra.mxu0 %vm392_vm1, %v1093_v39  ;;  %3061 = vmatprep.subr.mxu0 %v2605_v34  ;;  %v1099_v8 = vmul.f32 %v3346_v57, %v4190_v17 }
 0x445   : > { %v3348_v6 = vpop.eup %3347  ;;  %2996 = vmatprep.mubr.msk.f32.mxu0 %vm392_vm1, %v1095_v21  ;;  %v1582_v52 = vpop.xlane.xlu0 %1581  ;;  %3062 = vmatpush3.msra.mxu0 %v2605_v34 }
 0x446   : > { %v1097_v13 = vmul.f32 %v3348_v6, %v4185_v2  ;;  %3127 = vmatprep.subr.mxu0 %v4431_v56  ;;  %3361 = vrcp.f32 %v1582_v52 }
 0x447   : > { %v1081_v10 = vpop.xlane.xlu1 %1080  ;;  %v3350_v61 = vpop.eup %3349 }
 0x448   : > { %3363 = vrcp.f32 %v1081_v10  ;;  %2997 = vmatmul.mubr.msk.f32.gmra.mxu0 %vm392_vm1, %v1097_v13  ;;  %v1103_v2 = vmul.f32 %v3350_v61, %v4200_v12 }
 0x449   : > { %v3352_v26 = vpop.eup %3351  ;;  %2999 = vmatprep.mubr.msk.f32.mxu0 %vm392_vm1, %v1099_v8  ;;  %v1588_v40 = vpop.xlane.xlu0 %1587 }
 0x44a   : > { %v1101_v33 = vmul.f32 %v3352_v26, %v4195_v27  ;;  %3365 = vrcp.f32 %v1588_v40 }
 0x44b   : > { %v1585_v7 = vpop.xlane.xlu1 %1584  ;;  %v3354_v38 = vpop.eup %3353 }
 0x44c   : > { %3367 = vrcp.f32 %v1585_v7  ;;  %3000 = vmatmul.mubr.msk.f32.gmra.mxu0 %vm392_vm1, %v1101_v33  ;;  %v1107_v58 = vmul.f32 %v3354_v38, %v4213_v51 }
 0x44d   : > { %v3356_v18 = vpop.eup %3355  ;;  %3002 = vmatprep.mubr.msk.f32.mxu0 %vm392_vm1, %v1103_v2  ;;  %v1594_v17 = vpop.xlane.xlu0 %1593  ;;  %v2653_v2 = vld [vmem:[%s4664_s2 + $0xa0] sm:$0xff] }
 0x44e   : > { %v1105_v42 = vmul.f32 %v3356_v18, %v4205_v9  ;;  %3369 = vrcp.f32 %v1594_v17 }
 0x44f   : > { %v1591_v16 = vpop.xlane.xlu1 %1590  ;;  %v3358_v19 = vpop.eup %3357 }
 0x450   : > { %3371 = vrcp.f32 %v1591_v16  ;;  %3003 = vmatmul.mubr.msk.f32.gmra.mxu0 %vm392_vm1, %v1105_v42  ;;  %v1111_v22 = vmul.f32 %v3358_v19, %v4229_v14  ;;  %v2651_v16 = vld [vmem:[%s4664_s2 + $0x90] sm:$0xff] }
 0x451   : > { %v3360_v27 = vpop.eup %3359  ;;  %3005 = vmatprep.mubr.msk.f32.mxu0 %vm392_vm1, %v1107_v58  ;;  %v1600_v12 = vpop.xlane.xlu0 %1599 }
 0x452   : > { %v1109_v34 = vmul.f32 %v3360_v27, %v4224_v53  ;;  %3373 = vrcp.f32 %v1600_v12 }
 0x453   : > { %v1597_v39 = vpop.xlane.xlu1 %1596  ;;  %v3362_v21 = vpop.eup %3361 }
 0x454   : > { %3375 = vrcp.f32 %v1597_v39  ;;  %3006 = vmatmul.mubr.msk.f32.gmra.mxu0 %vm392_vm1, %v1109_v34  ;;  %v1629_v52 = vmul.f32 %v3362_v21, %v4242_v55 }
 0x455   : > { %v3364_v9 = vpop.eup %3363  ;;  %3008 = vmatprep.mubr.msk.f32.mxu0 %vm392_vm1, %v1111_v22  ;;  %v1606_v51 = vpop.xlane.xlu0 %1605 }
 0x456   : > { %v1113_v57 = vmul.f32 %v3364_v9, %v4237_v45  ;;  %3377 = vrcp.f32 %v1606_v51  ;;  %v2655_v45 = vld [vmem:[%s4664_s2 + $0xb0] sm:$0xff] }
 0x457   : > { %v1603_v6 = vpop.xlane.xlu1 %1602  ;;  %v3366_v13 = vpop.eup %3365 }
 0x458   : > { %3379 = vrcp.f32 %v1603_v6  ;;  %3009 = vmatmul.mubr.msk.f32.gmra.mxu0 %vm392_vm1, %v1113_v57  ;;  %v1633_v61 = vmul.f32 %v3366_v13, %v4258_v25 }
 0x459   : > { %v3368_v53 = vpop.eup %3367  ;;  %3063 = vmatprep.mubr.msk.f32.mxu0 %vm392_vm1, %v1629_v52  ;;  %v1612_v14 = vpop.xlane.xlu0 %1611 }
 0x45a   : > { %v1631_v10 = vmul.f32 %v3368_v53, %v4252_v41  ;;  %3381 = vrcp.f32 %v1612_v14  ;;  %v2654_v41 = vld [vmem:[%s4664_s2 + $0xa8] sm:$0xff] }
 0x45b   : > { %v1609_v8 = vpop.xlane.xlu1 %1608  ;;  %v3370_v26 = vpop.eup %3369 }
 0x45c   : > { %3383 = vrcp.f32 %v1609_v8  ;;  %3064 = vmatmul.mubr.msk.f32.vlgmr.msra.gmra.mxu0 %vm392_vm1, %v1631_v10  ;;  %v1637_v7 = vmul.f32 %v3370_v26, %v4268_v15 }
 0x45d   : > { %v3372_v55 = vpop.eup %3371  ;;  %3066 = vmatprep.mubr.msk.f32.mxu0 %vm392_vm1, %v1633_v61  ;;  %v1618_v40 = vpop.xlane.xlu0 %1617  ;;  %3128 = vmatpush3.msra.mxu0 %v4431_v56 }
 0x45e   : > { %v1635_v25 = vmul.f32 %v3372_v55, %v4263_v35  ;;  %3129 = vmatprep.subr.mxu0 %v2655_v45  ;;  %3385 = vrcp.f32 %v1618_v40  ;;  %v2652_v35 = vld [vmem:[%s4664_s2 + $0x98] sm:$0xff] }
 0x45f   : > { %v1615_v33 = vpop.xlane.xlu1 %1614  ;;  %3130 = vmatpush3.msra.mxu0 %v2655_v45  ;;  %v3374_v38 = vpop.eup %3373 }
 0x460   : > { %3387 = vrcp.f32 %v1615_v33  ;;  %3067 = vmatmul.mubr.msk.f32.gmra.mxu0 %vm392_vm1, %v1635_v25  ;;  %3131 = vmatprep.subr.mxu0 %v2654_v41  ;;  %v1641_v42 = vmul.f32 %v3374_v38, %v4278_v32 }
 0x461   : > { %v3376_v56 = vpop.eup %3375  ;;  %3069 = vmatprep.mubr.msk.f32.mxu0 %vm392_vm1, %v1637_v7  ;;  %v1624_v18 = vpop.xlane.xlu0 %1623  ;;  %3132 = vmatpush3.msra.mxu0 %v2654_v41 }
 0x462   : > { %v1639_v15 = vmul.f32 %v3376_v56, %v4273_v54  ;;  %3133 = vmatprep.subr.mxu0 %v2653_v2  ;;  %3389 = vrcp.f32 %v1624_v18 }
 0x463   : > { %v1621_v17 = vpop.xlane.xlu1 %1620  ;;  %3134 = vmatpush3.msra.mxu0 %v2653_v2  ;;  %v3378_v58 = vpop.eup %3377 }
 0x464   : > { %3391 = vrcp.f32 %v1621_v17  ;;  %3070 = vmatmul.mubr.msk.f32.gmra.mxu0 %vm392_vm1, %v1639_v15  ;;  %3135 = vmatprep.subr.mxu0 %v2652_v35  ;;  %v1645_v12 = vmul.f32 %v3378_v58, %v4288_v37 }
 0x465   : > { %v3380_v19 = vpop.eup %3379  ;;  %3072 = vmatprep.mubr.msk.f32.mxu0 %vm392_vm1, %v1641_v42  ;;  %v2128_v27 = vpop.xlane.xlu0 %2127  ;;  %3136 = vmatpush3.msra.mxu0 %v2652_v35 }
 0x466   : > { %v1643_v54 = vmul.f32 %v3380_v19, %v4283_v29  ;;  %3137 = vmatprep.subr.mxu0 %v2651_v16  ;;  %3393 = vrcp.f32 %v2128_v27 }
 0x467   : > { %v1627_v32 = vpop.xlane.xlu1 %1626  ;;  %3138 = vmatpush3.msra.mxu0 %v2651_v16  ;;  %v3382_v34 = vpop.eup %3381 }
 0x468   : > { %3395 = vrcp.f32 %v1627_v32  ;;  %3073 = vmatmul.mubr.msk.f32.gmra.mxu0 %vm392_vm1, %v1643_v54  ;;  %v1649_v29 = vmul.f32 %v3382_v34, %v4298_v11 }
 0x469   : > { %v3384_v39 = vpop.eup %3383  ;;  %3075 = vmatprep.mubr.msk.f32.mxu0 %vm392_vm1, %v1645_v12  ;;  %v2134_v22 = vpop.xlane.xlu0 %2133 }
 0x46a   : > { %v1647_v21 = vmul.f32 %v3384_v39, %v4293_v3  ;;  %3397 = vrcp.f32 %v2134_v22 }
 0x46b   : > { %v2131_v9 = vpop.xlane.xlu1 %2130  ;;  %v3386_v51 = vpop.eup %3385 }
 0x46c   : > { %3399 = vrcp.f32 %v2131_v9  ;;  %3076 = vmatmul.mubr.msk.f32.gmra.mxu0 %vm392_vm1, %v1647_v21  ;;  %v1653_v13 = vmul.f32 %v3386_v51, %v4308_v59 }
 0x46d   : > { %v3388_v37 = vpop.eup %3387  ;;  %3078 = vmatprep.mubr.msk.f32.mxu0 %vm392_vm1, %v1649_v29  ;;  %v2140_v57 = vpop.xlane.xlu0 %2139 }
 0x46e   : > { %v1651_v6 = vmul.f32 %v3388_v37, %v4303_v43  ;;  %3401 = vrcp.f32 %v2140_v57 }
 0x46f   : > { %v2137_v52 = vpop.xlane.xlu1 %2136  ;;  %v3390_v53 = vpop.eup %3389 }
 0x470   : > { %3403 = vrcp.f32 %v2137_v52  ;;  %3079 = vmatmul.mubr.msk.f32.gmra.mxu0 %vm392_vm1, %v1651_v6  ;;  %v1657_v8 = vmul.f32 %v3390_v53, %v4318_v4 }
 0x471   : > { %v3392_v3 = vpop.eup %3391  ;;  %3081 = vmatprep.mubr.msk.f32.mxu0 %vm392_vm1, %v1653_v13  ;;  %v2146_v11 = vpop.xlane.xlu0 %2145 }
 0x472   : > { %v1655_v14 = vmul.f32 %v3392_v3, %v4313_v1  ;;  %3405 = vrcp.f32 %v2146_v11 }
 0x473   : > { %v2143_v10 = vpop.xlane.xlu1 %2142  ;;  %v3394_v61 = vpop.eup %3393 }
 0x474   : > { %3407 = vrcp.f32 %v2143_v10  ;;  %3082 = vmatmul.mubr.msk.f32.gmra.mxu0 %vm392_vm1, %v1655_v14  ;;  %v2175_v55 = vmul.f32 %v3394_v61, %v4328_v28 }
 0x475   : > { %v3396_v43 = vpop.eup %3395  ;;  %3084 = vmatprep.mubr.msk.f32.mxu0 %vm392_vm1, %v1657_v8  ;;  %v2152_v59 = vpop.xlane.xlu0 %2151 }
 0x476   : > { %v1659_v45 = vmul.f32 %v3396_v43, %v4323_v44  ;;  %3409 = vrcp.f32 %v2152_v59 }
 0x477   : > { %v2149_v26 = vpop.xlane.xlu1 %2148  ;;  %v3398_v40 = vpop.eup %3397 }
 0x478   : > { %3411 = vrcp.f32 %v2149_v26  ;;  %3085 = vmatmul.mubr.msk.f32.gmra.mxu0 %vm392_vm1, %v1659_v45  ;;  %v2179_v33 = vmul.f32 %v3398_v40, %v4338_v46 }
 0x479   : > { %v3400_v1 = vpop.eup %3399  ;;  %3139 = vmatprep.mubr.msk.f32.mxu0 %vm392_vm1, %v2175_v55  ;;  %v2158_v4 = vpop.xlane.xlu0 %2157 }
 0x47a   : > { %v2177_v41 = vmul.f32 %v3400_v1, %v4332_v47  ;;  %3413 = vrcp.f32 %v2158_v4 }
 0x47b   : > { %v2155_v25 = vpop.xlane.xlu1 %2154  ;;  %v3402_v7 = vpop.eup %3401 }
 0x47c   : > { %3415 = vrcp.f32 %v2155_v25  ;;  %3140 = vmatmul.mubr.msk.f32.vlgmr.msra.gmra.mxu0 %vm392_vm1, %v2177_v41  ;;  %v2183_v38 = vmul.f32 %v3402_v7, %v4347_v0  ;;  %v3427_v25 = vld [vmem:[%s3491_s28 + $0x8] sm:$0xff] }
 0x47d   : > { %v3404_v44 = vpop.eup %3403  ;;  %3142 = vmatprep.mubr.msk.f32.mxu0 %vm392_vm1, %v2179_v33  ;;  %v769_v33 = vadd.f32 %v3427_v25, %v3912_v5 }
 0x47e   : > { %v2181_v28 = vmul.f32 %v3404_v44, %v4342_v36  ;;  %v3428_v44 = vld [vmem:[%s3491_s28] sm:$0xff] }
 0x47f   : > { %v2161_v2 = vpop.xlane.xlu1 %2160  ;;  %v3406_v56 = vpop.eup %3405 }
 0x480   : > { %3417 = vrcp.f32 %v2161_v2  ;;  %3143 = vmatmul.mubr.msk.f32.gmra.mxu0 %vm392_vm1, %v2181_v28  ;;  %v2187_v15 = vmul.f32 %v3406_v56, %v4356_v31  ;;  %v4703_v28 = vld [vmem:[#allocation13_spill] sm:$0xff] }
 0x481   : > { %v3408_v47 = vpop.eup %3407  ;;  %3145 = vmatprep.mubr.msk.f32.mxu0 %vm392_vm1, %v2183_v38  ;;  %v2164_v46 = vpop.xlane.xlu0 %2163  ;;  %v768_v2 = vadd.f32 %v3428_v44, %v4703_v28  ;;  %v4712_v44 = vld [vmem:[#allocation19_spill] sm:$0xff] }
 0x482   : > { %3419 = vrcp.f32 %v2164_v46  ;;  %v2185_v18 = vmul.f32 %v3408_v47, %v4351_v50  ;;  %v3429_v47 = vld [vmem:[%s3491_s28 + $0x18] sm:$0xff]  ;;  %v4704_v46 = vld [vmem:[#allocation14_spill] sm:$0xff] }
 0x483   : > { %v2167_v35 = vpop.xlane.xlu1 %2166  ;;  %v3410_v17 = vpop.eup %3409 }
 0x484   : > { %3421 = vrcp.f32 %v2167_v35  ;;  %3146 = vmatmul.mubr.msk.f32.gmra.mxu0 %vm392_vm1, %v2185_v18  ;;  %v2191_v16 = vmul.f32 %v3410_v17, %v4365_v49  ;;  %v771_v18 = vadd.f32 %v3429_v47, %v4704_v46  ;;  %v3430_v17 = vld [vmem:[%s3491_s28 + $0x10] sm:$0xff]  ;;  %v4713_v47 = vld [vmem:[#allocation6_spill] sm:$0xff] }
 0x485   : > { %v3412_v36 = vpop.eup %3411  ;;  %3148 = vmatprep.mubr.msk.f32.mxu0 %vm392_vm1, %v2187_v15  ;;  %v2170_v0 = vpop.xlane.xlu0 %2169  ;;  %v4714_v46 = vld [vmem:[#allocation20_spill] sm:$0xff] }
 0x486   : > { %3423 = vrcp.f32 %v2170_v0  ;;  %v2189_v42 = vmul.f32 %v3412_v36, %v4360_v62  ;;  %v4705_v36 = vld [vmem:[#allocation15_spill] sm:$0xff] }
 0x487   : > { %v3414_v58 = vpop.eup %3413  ;;  %v770_v0 = vadd.f32 %v3430_v17, %v4705_v36  ;;  %v4716_v17 = vld [vmem:[#allocation21_spill] sm:$0xff] }
 0x488   : > { %3149 = vmatmul.mubr.msk.f32.gmra.mxu0 %vm392_vm1, %v2189_v42  ;;  %v2195_v27 = vmul.f32 %v3414_v58, %v4374_v60 }
 0x489   : > { %v3416_v50 = vpop.eup %3415  ;;  %v2173_v19 = vpop.xlane.xlu1 %2172  ;;  %3151 = vmatprep.mubr.msk.f32.mxu0 %vm392_vm1, %v2191_v16 }
 0x48a   : > { %3425 = vrcp.f32 %v2173_v19  ;;  %v2193_v31 = vmul.f32 %v3416_v50, %v4369_v23  ;;  %v3431_v19 = vld [vmem:[%s3491_s28 + $0x28] sm:$0xff] }
 0x48c   : > { %3152 = vmatmul.mubr.msk.f32.gmra.mxu0 %vm392_vm1, %v2193_v31  ;;  %v4706_v31 = vld [vmem:[#allocation16_spill] sm:$0xff] }
 0x48d   : > { %v3418_v54 = vpop.eup %3417  ;;  %3154 = vmatprep.mubr.msk.f32.mxu0 %vm392_vm1, %v2195_v27  ;;  %v773_v27 = vadd.f32 %v3431_v19, %v4706_v31 }
 0x48e   : > { %v2197_v62 = vmul.f32 %v3418_v54, %v4380_v48 }
 0x48f   : > { %v3420_v49 = vpop.eup %3419 }
 0x490   : > { %3155 = vmatmul.mubr.msk.f32.gmra.mxu0 %vm392_vm1, %v2197_v62  ;;  %v2199_v32 = vmul.f32 %v3420_v49, %v4386_v20 }
 0x491   : > { %v3422_v12 = vpop.eup %3421 }
 0x492   : > { %3157 = vmatprep.mubr.msk.f32.mxu0 %vm392_vm1, %v2199_v32  ;;  %v2201_v34 = vmul.f32 %v3422_v12, %v4382_v30  ;;  %v4707_v12 = vld [vmem:[#allocation2_spill] sm:$0xff] }
 0x493   : > { %v3424_v23 = vpop.eup %3423 }
 0x494   : > { %3158 = vmatmul.mubr.msk.f32.gmra.mxu0 %vm392_vm1, %v2201_v34  ;;  %v2203_v60 = vmul.f32 %v3424_v23, %v4392_v24  ;;  %v4708_v34 = vld [vmem:[#allocation17_spill] sm:$0xff] }
 0x495   : > { %v772_v23 = vadd.f32 %v4708_v34, %v4707_v12  ;;  %v4722_v12 = vld [vmem:[#allocation24_spill] sm:$0xff] }
 0x496   : > { %3160 = vmatprep.mubr.msk.f32.mxu0 %vm392_vm1, %v2203_v60 }
 0x497   : > { %v3426_v39 = vpop.eup %3425 }
 0x498   : > { %v2205_v48 = vmul.f32 %v3426_v39, %v4396_v63 }
 0x49a   : > { %3161 = vmatmul.mubr.msk.f32.gmra.mxu0 %vm392_vm1, %v2205_v48 }
 0x4f9   : > { %v2989_v22 = vpop.f32.mrf.mxu0 }
 0x4fa   : > { %v1315_v38 = vadd.f32 %v2989_v22, %v769_v33  ;;  %v4711_v33 = vld [vmem:[#allocation3_spill] sm:$0xff] }
 0x4fb   : > { %v1235_v21 = vpop.f32.mrf.mxu0  ;;  %v774_v28 = vadd.f32 %v4712_v44, %v4711_v33 }
 0x4fc   : > { %v1314_v35 = vadd.f32 %v1235_v21, %v768_v2  ;;  %v4709_v21 = vld [vmem:[#allocation4_spill] sm:$0xff] }
 0x500   : > { %v2992_v20 = vpop.f32.mrf.mxu0 }
 0x501   : > { %v1317_v42 = vadd.f32 %v2992_v20, %v771_v18  ;;  %v4710_v20 = vld [vmem:[#allocation18_spill] sm:$0xff] }
 0x502   : > { %v1245_v9 = vpop.f32.mrf.mxu0 }
 0x503   : > { %v1316_v54 = vadd.f32 %v1245_v9, %v770_v0 }
 0x504   : > { %v2995_v29 = vpop.f32.mrf.mxu0 }
 0x505   : > { %v1319_v60 = vadd.f32 %v2995_v29, %v773_v27  ;;  %v4719_v27 = vld [vmem:[#allocation7_spill] sm:$0xff] }
 0x506   : > { %v1255_v51 = vpop.f32.mrf.mxu0 }
 0x507   : > { %v1318_v9 = vadd.f32 %v1255_v51, %v772_v23  ;;  %v777_v51 = vadd.f32 %v4714_v46, %v4713_v47 }
 0x508   : > { %v4534_v37 = vpop.f32.mrf.mxu0 }
 0x50a   : > { %v4536_v30 = vpop.f32.mrf.mxu0 }
 0x50c   : > { %v4538_v57 = vpop.f32.mrf.mxu0 }
 0x50e   : > { %v4540_v24 = vpop.f32.mrf.mxu0 }
 0x510   : > { %v4542_v6 = vpop.f32.mrf.mxu0 }
 0x512   : > { %v4544_v52 = vpop.f32.mrf.mxu0 }
 0x514   : > { %v4546_v63 = vpop.f32.mrf.mxu0 }
 0x516   : > { %v4548_v13 = vpop.f32.mrf.mxu0 }
 0x518   : > { %v4550_v53 = vpop.f32.mrf.mxu0 }
 0x51a   : > { %v4552_v3 = vpop.f32.mrf.mxu0 }
 0x51c   : > { %v3065_v11 = vpop.f32.mrf.mxu0 }
 0x51d   : > { %v1861_v15 = vadd.f32 %v3065_v11, %v1315_v38  ;;  %v775_v11 = vadd.f32 %v4710_v20, %v4709_v21 }
 0x51e   : > { %v1781_v14 = vpop.f32.mrf.mxu0 }
 0x51f   : > { %v1860_v16 = vadd.f32 %v1781_v14, %v1314_v35  ;;  %v1321_v29 = vadd.f32 %v4534_v37, %v775_v11 }
 0x520   : > { %v3068_v10 = vpop.f32.mrf.mxu0 }
 0x521   : > { %v1863_v62 = vadd.f32 %v3068_v10, %v1317_v42 }
 0x522   : > { %v1791_v8 = vpop.f32.mrf.mxu0 }
 0x523   : > { %v1862_v39 = vadd.f32 %v1791_v8, %v1316_v54  ;;  %v4720_v54 = vld [vmem:[#allocation23_spill] sm:$0xff] }
 0x524   : > { %v3071_v61 = vpop.f32.mrf.mxu0 }
 0x525   : > { %v1865_v14 = vadd.f32 %v3071_v61, %v1319_v60  ;;  %v1320_v61 = vadd.f32 %v4536_v30, %v774_v28  ;;  %v4727_v28 = vld [vmem:[#allocation11_spill] sm:$0xff] }
 0x526   : > { %v1801_v43 = vpop.f32.mrf.mxu0 }
 0x527   : > { %v1864_v8 = vadd.f32 %v1801_v43, %v1318_v9  ;;  %v1323_v43 = vadd.f32 %v4538_v57, %v777_v51  ;;  %v778_v57 = vadd.f32 %v4720_v54, %v4719_v27 }
 0x528   : > { %v3074_v59 = vpop.f32.mrf.mxu0 }
 0x529   : > { %v1867_v18 = vadd.f32 %v3074_v59, %v1321_v29  ;;  %v1324_v34 = vadd.f32 %v4544_v52, %v778_v57 }
 0x52a   : > { %v1811_v45 = vpop.f32.mrf.mxu0 }
 0x52b   : > { %v1866_v36 = vadd.f32 %v1811_v45, %v1320_v61 }
 0x52c   : > { %v4554_v26 = vpop.f32.mrf.mxu0 }
 0x52e   : > { %v4556_v55 = vpop.f32.mrf.mxu0 }
 0x530   : > { %v4558_v40 = vpop.f32.mrf.mxu0 }
 0x532   : > { %v4560_v1 = vpop.f32.mrf.mxu0 }
 0x533   : > { %v1870_v21 = vadd.f32 %v4560_v1, %v1324_v34 }
 0x534   : > { %v4562_v4 = vpop.f32.mrf.mxu0 }
 0x536   : > { %v4564_v41 = vpop.f32.mrf.mxu0 }
 0x538   : > { %v4568_v7 = vpop.f32.mrf.mxu0 }
 0x53a   : > { %v4572_v56 = vpop.f32.mrf.mxu0 }
 0x53c   : > { %v3141_v5 = vpop.f32.mrf.mxu0 }
 0x53d   : > { %v2407_v58 = vadd.f32 %v3141_v5, %v1861_v15  ;;  %v4715_v5 = vld [vmem:[#allocation5_spill] sm:$0xff] }
 0x53e   : > { %v2327_v50 = vpop.f32.mrf.mxu0  ;;  %v776_v37 = vadd.f32 %v4716_v17, %v4715_v5 }
 0x53f   : > { %2423 = vst.msk [vmem:[%s4581_s15 + $0x8] sm:$0xff] %vm198_vm0, %v2407_v58  ;;  %v2406_v49 = vadd.f32 %v2327_v50, %v1860_v16  ;;  %v4717_v16 = vld [vmem:[#allocation8_spill] sm:$0xff]  ;;  %v4718_v58 = vld [vmem:[#allocation22_spill] sm:$0xff]  ;;  %v1869_v50 = vadd.f32 %v4554_v26, %v1323_v43 }
 0x540   : > { %v3144_v32 = vpop.f32.mrf.mxu0  ;;  %v779_v30 = vadd.f32 %v4718_v58, %v4717_v16  ;;  %v1322_v59 = vadd.f32 %v4540_v24, %v776_v37  ;;  %v4721_v24 = vld [vmem:[#allocation10_spill] sm:$0xff] }
 0x541   : > { %2422 = vst.msk [vmem:[%s4581_s15] sm:$0xff] %vm198_vm0, %v2406_v49  ;;  %v2409_v48 = vadd.f32 %v3144_v32, %v1863_v62  ;;  %v781_v26 = vadd.f32 %v4722_v12, %v4721_v24 }
 0x542   : > { %v2337_v22 = vpop.f32.mrf.mxu0  ;;  %v1325_v45 = vadd.f32 %v4542_v6, %v779_v30  ;;  %v1868_v62 = vadd.f32 %v4556_v55, %v1322_v59  ;;  %v4723_v6 = vld [vmem:[#allocation9_spill] sm:$0xff] }
 0x543   : > { %2425 = vst.msk [vmem:[%s4581_s15 + $0x18] sm:$0xff] %vm198_vm0, %v2409_v48  ;;  %v2408_v10 = vadd.f32 %v2337_v22, %v1862_v39  ;;  %v4724_v48 = vld [vmem:[#allocation25_spill] sm:$0xff]  ;;  %v1327_v22 = vadd.f32 %v4546_v63, %v781_v26 }
 0x544   : > { %v3147_v25 = vpop.f32.mrf.mxu0  ;;  %v1871_v23 = vadd.f32 %v4558_v40, %v1325_v45  ;;  %v780_v55 = vadd.f32 %v4724_v48, %v4723_v6 }
 0x545   : > { %2424 = vst.msk [vmem:[%s4581_s15 + $0x10] sm:$0xff] %vm198_vm0, %v2408_v10  ;;  %v2411_v2 = vadd.f32 %v3147_v25, %v1865_v14  ;;  %v1873_v40 = vadd.f32 %v4562_v4, %v1327_v22  ;;  %v4725_v10 = vld [vmem:[#allocation12_spill] sm:$0xff]  ;;  %v4726_v25 = vld [vmem:[#allocation26_spill] sm:$0xff] }
 0x546   : > { %v2347_v38 = vpop.f32.mrf.mxu0  ;;  %v1326_v52 = vadd.f32 %v4548_v13, %v780_v55  ;;  %v783_v33 = vadd.f32 %v4726_v25, %v4725_v10  ;;  %v4728_v13 = vld [vmem:[#allocation27_spill] sm:$0xff] }
 0x547   : > { %2427 = vst.msk [vmem:[%s4581_s15 + $0x28] sm:$0xff] %vm198_vm0, %v2411_v2  ;;  %v2410_v35 = vadd.f32 %v2347_v38, %v1864_v8  ;;  %v782_v29 = vadd.f32 %v4728_v13, %v4727_v28 }
 0x548   : > { %v3150_v15 = vpop.f32.mrf.mxu0  ;;  %v1872_v63 = vadd.f32 %v4564_v41, %v1326_v52  ;;  %v1329_v4 = vadd.f32 %v4550_v53, %v783_v33 }
 0x549   : > { %2426 = vst.msk [vmem:[%s4581_s15 + $0x20] sm:$0xff] %vm198_vm0, %v2410_v35  ;;  %v2413_v0 = vadd.f32 %v3150_v15, %v1867_v18  ;;  %v1328_v2 = vadd.f32 %v4552_v3, %v782_v29 }
 0x54a   : > { %v2357_v42 = vpop.f32.mrf.mxu0  ;;  %v1875_v38 = vadd.f32 %v4568_v7, %v1329_v4 }
 0x54b   : > { %2429 = vst.msk [vmem:[%s4581_s15 + $0x38] sm:$0xff] %vm198_vm0, %v2413_v0  ;;  %v2412_v19 = vadd.f32 %v2357_v42, %v1866_v36  ;;  %v1874_v47 = vadd.f32 %v4572_v56, %v1328_v2 }
 0x54c   : > { %v3153_v31 = vpop.f32.mrf.mxu0 }
 0x54d   : > { %2428 = vst.msk [vmem:[%s4581_s15 + $0x30] sm:$0xff] %vm198_vm0, %v2412_v19  ;;  %v2415_v49 = vadd.f32 %v3153_v31, %v1869_v50 }
 0x54e   : > { %v2367_v32 = vpop.f32.mrf.mxu0 }
 0x54f   : > { %2431 = vst.msk [vmem:[%s4581_s15 + $0x48] sm:$0xff] %vm198_vm0, %v2415_v49  ;;  %v2414_v60 = vadd.f32 %v2367_v32, %v1868_v62 }
 0x550   : > { %v3156_v39 = vpop.f32.mrf.mxu0 }
 0x551   : > { %2430 = vst.msk [vmem:[%s4581_s15 + $0x40] sm:$0xff] %vm198_vm0, %v2414_v60  ;;  %v2417_v20 = vadd.f32 %v3156_v39, %v1871_v23 }
 0x552   : > { %v2377_v11 = vpop.f32.mrf.mxu0 }
 0x553   : > { %2433 = vst.msk [vmem:[%s4581_s15 + $0x58] sm:$0xff] %vm198_vm0, %v2417_v20  ;;  %v2416_v9 = vadd.f32 %v2377_v11, %v1870_v21 }
 0x554   : > { %v3159_v14 = vpop.f32.mrf.mxu0 }
 0x555   : > { %2432 = vst.msk [vmem:[%s4581_s15 + $0x50] sm:$0xff] %vm198_vm0, %v2416_v9  ;;  %v2419_v1 = vadd.f32 %v3159_v14, %v1873_v40 }
 0x556   : > { %v2387_v44 = vpop.f32.mrf.mxu0 }
 0x557   : > { %2435 = vst.msk [vmem:[%s4581_s15 + $0x68] sm:$0xff] %vm198_vm0, %v2419_v1  ;;  %v2418_v8 = vadd.f32 %v2387_v44, %v1872_v63 }
 0x559   : > { %2434 = vst.msk [vmem:[%s4581_s15 + $0x60] sm:$0xff] %vm198_vm0, %v2418_v8 }
 0x55a   : > { %v3162_v41 = vpop.f32.mrf.mxu0 }
 0x55b   : > { %v2421_v46 = vadd.f32 %v3162_v41, %v1875_v38 }
 0x55c   : > { %v2397_v51 = vpop.f32.mrf.mxu0 }
 0x55d   : > { %2437 = vst.msk [vmem:[%s4581_s15 + $0x78] sm:$0xff] %vm198_vm0, %v2421_v46  ;;  %v2420_v61 = vadd.f32 %v2397_v51, %v1874_v47 }
 0x55f   : > { %2436 = vst.msk [vmem:[%s4581_s15 + $0x70] sm:$0xff] %vm198_vm0, %v2420_v61 }
 0x560 PF: > { %s13_s12 = sadd.s32 1, %s3438_s12  }
 0x561   : > { %p10_p4 = scmp.ge.s32.totalorder %s13_s12, 4  }
 0x563   :  { %12 = sbr.rel (!%p10_p4) target bundleno = 1 (0x1), region = 68 }

</bundles_post_ra>
